<compile_context>
chip_gen: v7x
topology: tpu7x:2x2x1
jax: 0.10.0
libtpu: 0.0.40
codegen_flags: <defaults>
</compile_context>

<pallas_src>
import functools

import jax
import jax.numpy as jnp
from jax.experimental import pallas as pl
from jax.experimental.pallas import tpu as pltpu


def _default_vmem_limit():
    # Leave headroom below physical VMEM (128 MiB v5e/v6e, 64 MiB v7x).
    try:
        return int(pltpu.get_tpu_info().vmem_capacity_bytes * 3 // 4)
    except Exception:  # conservative fallback, < v7x physical 64 MiB
        return 48 * 1024 * 1024


_VMEM_LIMIT_BYTES = _default_vmem_limit()


# ----------------------------- Pallas kernels -----------------------------

def _mha_sublayer_kernel(xq_ref, xkv_ref, m_ref,
                         wq_ref, bq_ref, wkv_ref, bkv_ref,
                         wo_ref, bo_ref, g_ref, beta_ref,
                         out_ref, *rest,
                         n_heads, head_dim, write_attn):
    """(batch b, query tile i): fused QKV proj + attention + out proj + residual + LN."""
    if write_attn:
        attn_ref, ctx_ref = rest
    else:
        (ctx_ref,) = rest

    D = n_heads * head_dim
    tq = xq_ref.shape[0]
    Lkv = xkv_ref.shape[0]

    xq = xq_ref[...]                                     # (tq, D)  f32 (residual)

    # Fused projections: bf16 MXU operands, f32 accumulation, f32 bias add.
    # 1/sqrt(head_dim) is already folded into wq / bq.
    q = jnp.dot(xq.astype(jnp.bfloat16), wq_ref[...],
                preferred_element_type=jnp.float32) + bq_ref[...]         # (tq, D)
    kv = jnp.dot(xkv_ref[...].astype(jnp.bfloat16), wkv_ref[...],
                 preferred_element_type=jnp.float32) + bkv_ref[...]       # (Lkv, 2D)

    q_bf = q.astype(jnp.bfloat16)
    k_bf = kv[:, :D].astype(jnp.bfloat16)
    v_bf = kv[:, D:].astype(jnp.bfloat16)

    # Hoisted out of the head loop: single compare + broadcast per grid step.
    mask_zero = jnp.broadcast_to(m_ref[...] == 0.0, (tq, Lkv))

    for h in range(n_heads):                             # static unrolled head loop
        sl = slice(h * head_dim, (h + 1) * head_dim)

        # q @ k^T without an explicit transpose of K (contract feature dims).
        energy = jax.lax.dot_general(
            q_bf[:, sl], k_bf[:, sl], (((1,), (1,)), ((), ())),
            preferred_element_type=jnp.float32)          # (tq, Lkv)
        energy = jnp.where(mask_zero, -1e10, energy)     # masked_fill(mask==0, -1e10)

        # f32 softmax with exact divide.
        energy = energy - jnp.max(energy, axis=-1, keepdims=True)
        p = jnp.exp(energy)
        attn = p / jnp.sum(p, axis=-1, keepdims=True)

        if write_attn:
            attn_ref[h] = attn                           # (tq, Lkv) per head

        # dropout(attn) == attn in eval mode; lane-dense scratch slab, no concat.
        ctx_ref[:, sl] = jnp.dot(attn.astype(jnp.bfloat16), v_bf[:, sl],
                                 preferred_element_type=jnp.float32)

    # output projection + residual + LayerNorm (eps = 1e-5, PyTorch default)
    y = jnp.dot(ctx_ref[...].astype(jnp.bfloat16), wo_ref[...],
                preferred_element_type=jnp.float32) + bo_ref[...]
    z = xq + y
    mean = jnp.mean(z, axis=-1, keepdims=True)
    var = jnp.mean((z - mean) ** 2, axis=-1, keepdims=True)
    zn = (z - mean) * jax.lax.rsqrt(var + 1e-5)
    out_ref[...] = (zn * g_ref[...] + beta_ref[...]).astype(out_ref.dtype)


def _ffn_add_ln_kernel(x_ref, w1_ref, b1_ref, w2_ref, b2_ref,
                       g_ref, beta_ref, o_ref, acc_ref):
    """(row tile i, hidden tile f): relu(x@w1+b1)@w2 accumulated, then +b2, residual, LN."""
    f = pl.program_id(1)

    @pl.when(f == 0)
    def _():
        acc_ref[...] = jnp.zeros_like(acc_ref)

    x = x_ref[...]                                       # (tm, D) f32
    h = jnp.dot(x.astype(jnp.bfloat16), w1_ref[...],
                preferred_element_type=jnp.float32) + b1_ref[...]         # (tm, tf)
    h = jnp.maximum(h, 0.0)
    acc_ref[...] += jnp.dot(h.astype(jnp.bfloat16), w2_ref[...],
                            preferred_element_type=jnp.float32)           # (tm, D)

    @pl.when(f == pl.num_programs(1) - 1)
    def _():
        z = x + acc_ref[...] + b2_ref[...]
        mean = jnp.mean(z, axis=-1, keepdims=True)
        var = jnp.mean((z - mean) ** 2, axis=-1, keepdims=True)
        zn = (z - mean) * jax.lax.rsqrt(var + 1e-5)
        o_ref[...] = (zn * g_ref[...] + beta_ref[...]).astype(o_ref.dtype)


# ----------------------------- wrappers -----------------------------

def _pick_tile(n, candidates):
    for t in candidates:
        if n % t == 0:
            return t
    return n


def mha_sublayer(x_q, x_kv, mask, p, ln_g, ln_b, n_heads, return_attn):
    """Fused MHA sub-layer.  Returns (LN(x_q + MHA(x_q, x_kv, x_kv)), attn|None)."""
    B, Lq, D = x_q.shape
    Lkv = x_kv.shape[1]
    head_dim = D // n_heads

    mask2 = mask[:, 0]                                   # (B, Mrows, Lkv), narrow form
    Mrows = mask2.shape[1]

    tq = _pick_tile(Lq, (256, 128, 64, 32, 16, 8))
    grid = (B, Lq // tq)

    if Mrows == 1:                                       # padding mask (1 row per batch)
        mask_spec = pl.BlockSpec((None, 1, Lkv), lambda b, i: (b, 0, 0))
    else:                                                # causal mask (one row per query)
        mask_spec = pl.BlockSpec((None, tq, Lkv), lambda b, i: (b, i, 0))

    kernel = functools.partial(_mha_sublayer_kernel, n_heads=n_heads,
                               head_dim=head_dim, write_attn=return_attn)

    out_shape = [jax.ShapeDtypeStruct((B, Lq, D), x_q.dtype)]
    out_specs = [pl.BlockSpec((None, tq, D), lambda b, i: (b, i, 0))]
    if return_attn:
        out_shape.append(jax.ShapeDtypeStruct((B, n_heads, Lq, Lkv), jnp.float32))
        out_specs.append(
            pl.BlockSpec((None, n_heads, tq, Lkv), lambda b, i: (b, 0, i, 0)))

    results = pl.pallas_call(
        kernel,
        grid=grid,
        in_specs=[
            pl.BlockSpec((None, tq, D), lambda b, i: (b, i, 0)),      # x_q tile
            pl.BlockSpec((None, Lkv, D), lambda b, i: (b, 0, 0)),     # x_kv (full seq)
            mask_spec,                                                # mask (narrow)
            pl.BlockSpec((D, D), lambda b, i: (0, 0)),                # wq  (bf16, scale folded)
            pl.BlockSpec((1, D), lambda b, i: (0, 0)),                # bq  (f32, scale folded)
            pl.BlockSpec((D, 2 * D), lambda b, i: (0, 0)),            # wkv (bf16, fused K|V)
            pl.BlockSpec((1, 2 * D), lambda b, i: (0, 0)),            # bkv
            pl.BlockSpec((D, D), lambda b, i: (0, 0)),                # wo  (bf16)
            pl.BlockSpec((1, D), lambda b, i: (0, 0)),                # bo
            pl.BlockSpec((1, D), lambda b, i: (0, 0)),                # ln gamma
            pl.BlockSpec((1, D), lambda b, i: (0, 0)),                # ln beta
        ],
        out_specs=out_specs,
        out_shape=out_shape,
        scratch_shapes=[pltpu.VMEM((tq, D), jnp.float32)],            # lane-dense ctx slab
        compiler_params=pltpu.CompilerParams(
            dimension_semantics=("parallel", "parallel"),
            vmem_limit_bytes=_VMEM_LIMIT_BYTES),
    )(x_q, x_kv, mask2, p["wq"], p["bq"], p["wkv"], p["bkv"],
      p["wo"], p["bo"], ln_g, ln_b)

    if return_attn:
        return results[0], results[1]
    return results[0], None


def ffn_add_ln(x, ff_params, ln_g, ln_b):
    """Fused positionwise FFN + residual + LayerNorm, tiled over rows and hidden dim."""
    B, L, D = x.shape
    w1, b1, w2, b2 = ff_params
    F = w1.shape[1]
    M = B * L
    tm = _pick_tile(M, (512, 256, 128, 64, 32, 16, 8))
    tf = _pick_tile(F, (2048, 1024, 512, 256, 128, 64, 32))
    x2 = x.reshape(M, D)

    out = pl.pallas_call(
        _ffn_add_ln_kernel,
        grid=(M // tm, F // tf),                          # F axis last (reduction)
        in_specs=[
            pl.BlockSpec((tm, D), lambda i, f: (i, 0)),   # x (also residual)
            pl.BlockSpec((D, tf), lambda i, f: (0, f)),   # w1 (bf16)
            pl.BlockSpec((1, tf), lambda i, f: (0, f)),   # b1
            pl.BlockSpec((tf, D), lambda i, f: (f, 0)),   # w2 (bf16)
            pl.BlockSpec((1, D), lambda i, f: (0, 0)),    # b2
            pl.BlockSpec((1, D), lambda i, f: (0, 0)),    # ln gamma
            pl.BlockSpec((1, D), lambda i, f: (0, 0)),    # ln beta
        ],
        out_specs=pl.BlockSpec((tm, D), lambda i, f: (i, 0)),
        out_shape=jax.ShapeDtypeStruct((M, D), x.dtype),
        scratch_shapes=[pltpu.VMEM((tm, D), jnp.float32)],
        compiler_params=pltpu.CompilerParams(
            dimension_semantics=("parallel", "arbitrary"),
            vmem_limit_bytes=_VMEM_LIMIT_BYTES),
    )(x2, w1, b1, w2, b2, ln_g, ln_b)
    return out.reshape(B, L, D)


def decoder_layer_forward(trg, enc_src, trg_mask, src_mask, params, n_heads):
    # self-attention sub-layer (proj + attn + out-proj + residual + LN, fused)
    trg, _ = mha_sublayer(trg, trg, trg_mask, params["self_attn"],
                          params["attn_ln_g"], params["attn_ln_b"],
                          n_heads, return_attn=False)
    # encoder-decoder attention sub-layer
    # (reference module reuses attn_layer_norm here; enc_attn_layer_norm unused)
    trg, attention = mha_sublayer(trg, enc_src, src_mask, params["enc_attn"],
                                  params["attn_ln_g"], params["attn_ln_b"],
                                  n_heads, return_attn=True)
    # positionwise feedforward sub-layer (fused with residual + LN)
    trg = ffn_add_ln(trg, params["ff"], params["ff_ln_g"], params["ff_ln_b"])
    return trg, attention


# ----------------------------- param init -----------------------------

def _init_linear(key, d_in, d_out):
    k1, k2 = jax.random.split(key)
    bound = 1.0 / (d_in ** 0.5)
    w = jax.random.uniform(k1, (d_in, d_out), jnp.float32, -bound, bound)
    b = jax.random.uniform(k2, (d_out,), jnp.float32, -bound, bound)
    return w, b


def init_decoder_layer_params(key, hidden_dim, n_heads, posff_dim):
    keys = jax.random.split(key, 10)
    D = hidden_dim
    head_dim = D // n_heads
    inv_scale = 1.0 / float(head_dim) ** 0.5

    def mha_params(k4):
        kq, kk, kv, ko = k4
        wq, bq = _init_linear(kq, D, D)
        wk, bk = _init_linear(kk, D, D)
        wv, bv = _init_linear(kv, D, D)
        wo, bo = _init_linear(ko, D, D)
        return dict(
            # 1/sqrt(head_dim) folded into the Q projection; MXU weights in bf16.
            wq=(wq * inv_scale).astype(jnp.bfloat16),
            bq=(bq * inv_scale).reshape(1, D),
            # K and V weights pre-concatenated -> single MXU matmul in-kernel
            wkv=jnp.concatenate([wk, wv], axis=1).astype(jnp.bfloat16),
            bkv=jnp.concatenate([bk, bv]).reshape(1, 2 * D),
            wo=wo.astype(jnp.bfloat16),
            bo=bo.reshape(1, D),
        )

    w1, b1 = _init_linear(keys[8], D, posff_dim)
    w2, b2 = _init_linear(keys[9], posff_dim, D)

    return dict(
        self_attn=mha_params(keys[0:4]),
        enc_attn=mha_params(keys[4:8]),
        ff=(w1.astype(jnp.bfloat16), b1.reshape(1, posff_dim),
            w2.astype(jnp.bfloat16), b2.reshape(1, D)),
        # LayerNorm params (PyTorch default init: weight=1, bias=0), kept f32.
        attn_ln_g=jnp.ones((1, D), jnp.float32),
        attn_ln_b=jnp.zeros((1, D), jnp.float32),
        ff_ln_g=jnp.ones((1, D), jnp.float32),
        ff_ln_b=jnp.zeros((1, D), jnp.float32),
        # TODO(synk): enc_attn_layer_norm params exist in __init__ but are
        # never used by the reference forward(); omitted here.
    )


# ----------------------------- main -----------------------------

if __name__ == "__main__":
    B, TRG_LEN, SRC_LEN = 2, 8, 16
    HIDDEN, N_HEADS, POSFF = 32, 4, 64

    key = jax.random.PRNGKey(0)
    k_p, k_t, k_e = jax.random.split(key, 3)

    params = init_decoder_layer_params(k_p, HIDDEN, N_HEADS, POSFF)

    trg = jax.random.normal(k_t, (B, TRG_LEN, HIDDEN), jnp.float32)
    enc_src = jax.random.normal(k_e, (B, SRC_LEN, HIDDEN), jnp.float32)

    # causal target mask: (B, 1, trg_len, trg_len)
    causal = jnp.tril(jnp.ones((TRG_LEN, TRG_LEN), jnp.float32))
    trg_mask = jnp.broadcast_to(causal, (B, 1, TRG_LEN, TRG_LEN))

    # source padding mask: (B, 1, 1, src_len); batch 1 has last 4 tokens padded
    src_valid = jnp.stack([
        jnp.ones((SRC_LEN,), jnp.float32),
        jnp.concatenate([jnp.ones((SRC_LEN - 4,), jnp.float32),
                         jnp.zeros((4,), jnp.float32)]),
    ])
    src_mask = src_valid.reshape(B, 1, 1, SRC_LEN)

    fwd = jax.jit(functools.partial(decoder_layer_forward, n_heads=N_HEADS))
    out, attention = fwd(trg, enc_src, trg_mask, src_mask, params)
    jax.block_until_ready((out, attention))

    assert out.shape == (B, TRG_LEN, HIDDEN)
    assert attention.shape == (B, N_HEADS, TRG_LEN, SRC_LEN)
    assert bool(jnp.all(jnp.isfinite(out)))
    assert bool(jnp.all(jnp.isfinite(attention)))
    # attention rows must sum to 1 (softmax sanity)
    assert bool(jnp.allclose(jnp.sum(attention, axis=-1), 1.0, atol=1e-3))
    print("KERNEL_OK")
</pallas_src>

<mosaic_0001>
module attributes {stable_mosaic.version = 11 : i64} {
  func.func @_mha_sublayer_kernel(%arg0: i32, %arg1: i32, %arg2: memref<1x8x32xf32, #tpu.memory_space<vmem>>, %arg3: memref<1x8x32xf32, #tpu.memory_space<vmem>>, %arg4: memref<1x8x8xf32, #tpu.memory_space<vmem>>, %arg5: memref<32x32xbf16, #tpu.memory_space<vmem>>, %arg6: memref<1x32xf32, #tpu.memory_space<vmem>>, %arg7: memref<32x64xbf16, #tpu.memory_space<vmem>>, %arg8: memref<1x64xf32, #tpu.memory_space<vmem>>, %arg9: memref<32x32xbf16, #tpu.memory_space<vmem>>, %arg10: memref<1x32xf32, #tpu.memory_space<vmem>>, %arg11: memref<1x32xf32, #tpu.memory_space<vmem>>, %arg12: memref<1x32xf32, #tpu.memory_space<vmem>>, %arg13: memref<1x8x32xf32, #tpu.memory_space<vmem>>, %arg14: memref<8x32xf32, #tpu.memory_space<vmem>>) attributes {dimension_semantics = [#tpu.dimension_semantics<parallel>, #tpu.dimension_semantics<parallel>], iteration_bounds = array<i64: 2, 1>, scalar_prefetch = 0 : i64, scratch_operands = 1 : i64, tpu.core_type = #tpu.core_type<tc>, window_params = [{transform_indices = @transform_0, window_bounds = array<i64: 1, 8, 32>}, {transform_indices = @transform_1, window_bounds = array<i64: 1, 8, 32>}, {transform_indices = @transform_2, window_bounds = array<i64: 1, 8, 8>}, {pipeline_mode = #tpu.pipeline_mode<synchronous>, transform_indices = @transform_3, window_bounds = array<i64: 32, 32>}, {pipeline_mode = #tpu.pipeline_mode<synchronous>, transform_indices = @transform_4, window_bounds = array<i64: 1, 32>}, {pipeline_mode = #tpu.pipeline_mode<synchronous>, transform_indices = @transform_5, window_bounds = array<i64: 32, 64>}, {pipeline_mode = #tpu.pipeline_mode<synchronous>, transform_indices = @transform_6, window_bounds = array<i64: 1, 64>}, {pipeline_mode = #tpu.pipeline_mode<synchronous>, transform_indices = @transform_7, window_bounds = array<i64: 32, 32>}, {pipeline_mode = #tpu.pipeline_mode<synchronous>, transform_indices = @transform_8, window_bounds = array<i64: 1, 32>}, {pipeline_mode = #tpu.pipeline_mode<synchronous>, transform_indices = @transform_9, window_bounds = array<i64: 1, 32>}, {pipeline_mode = #tpu.pipeline_mode<synchronous>, transform_indices = @transform_10, window_bounds = array<i64: 1, 32>}, {transform_indices = @transform_11, window_bounds = array<i64: 1, 8, 32>}]} {
    %c0 = arith.constant 0 : index
    %c0_0 = arith.constant 0 : index
    %c0_1 = arith.constant 0 : index
    %0 = vector.load %arg2[%c0, %c0_0, %c0_1] : memref<1x8x32xf32, #tpu.memory_space<vmem>>, vector<1x8x32xf32>
    %1 = vector.shape_cast %0 : vector<1x8x32xf32> to vector<8x32xf32>
    %2 = arith.truncf %1 : vector<8x32xf32> to vector<8x32xbf16>
    %c0_2 = arith.constant 0 : index
    %c0_3 = arith.constant 0 : index
    %3 = vector.load %arg5[%c0_2, %c0_3] : memref<32x32xbf16, #tpu.memory_space<vmem>>, vector<32x32xbf16>
    %cst = arith.constant dense<0.000000e+00> : vector<8x32xf32>
    %4 = tpu.matmul %2, %3, %cst {dimension_numbers = #tpu.dot_dimension_numbers<[1], [0], [0], [1], [0, 0, 1, 1], [], []>} : vector<8x32xbf16>, vector<32x32xbf16>, vector<8x32xf32> -> vector<8x32xf32>
    %c0_4 = arith.constant 0 : index
    %c0_5 = arith.constant 0 : index
    %5 = vector.load %arg6[%c0_4, %c0_5] : memref<1x32xf32, #tpu.memory_space<vmem>>, vector<1x32xf32>
    %6 = vector.broadcast %5 : vector<1x32xf32> to vector<8x32xf32>
    %7 = arith.addf %4, %6 : vector<8x32xf32>
    %c0_6 = arith.constant 0 : index
    %c0_7 = arith.constant 0 : index
    %c0_8 = arith.constant 0 : index
    %8 = vector.load %arg3[%c0_6, %c0_7, %c0_8] : memref<1x8x32xf32, #tpu.memory_space<vmem>>, vector<1x8x32xf32>
    %9 = vector.shape_cast %8 : vector<1x8x32xf32> to vector<8x32xf32>
    %10 = arith.truncf %9 : vector<8x32xf32> to vector<8x32xbf16>
    %c0_9 = arith.constant 0 : index
    %c0_10 = arith.constant 0 : index
    %11 = vector.load %arg7[%c0_9, %c0_10] : memref<32x64xbf16, #tpu.memory_space<vmem>>, vector<32x64xbf16>
    %cst_11 = arith.constant dense<0.000000e+00> : vector<8x64xf32>
    %12 = tpu.matmul %10, %11, %cst_11 {dimension_numbers = #tpu.dot_dimension_numbers<[1], [0], [0], [1], [0, 0, 1, 1], [], []>} : vector<8x32xbf16>, vector<32x64xbf16>, vector<8x64xf32> -> vector<8x64xf32>
    %c0_12 = arith.constant 0 : index
    %c0_13 = arith.constant 0 : index
    %13 = vector.load %arg8[%c0_12, %c0_13] : memref<1x64xf32, #tpu.memory_space<vmem>>, vector<1x64xf32>
    %14 = vector.broadcast %13 : vector<1x64xf32> to vector<8x64xf32>
    %15 = arith.addf %12, %14 : vector<8x64xf32>
    %16 = arith.truncf %7 : vector<8x32xf32> to vector<8x32xbf16>
    %17 = vector.extract_strided_slice %15 {offsets = [0, 0], sizes = [8, 32], strides = [1, 1]} : vector<8x64xf32> to vector<8x32xf32>
    %18 = arith.truncf %17 : vector<8x32xf32> to vector<8x32xbf16>
    %19 = vector.extract_strided_slice %15 {offsets = [0, 32], sizes = [8, 32], strides = [1, 1]} : vector<8x64xf32> to vector<8x32xf32>
    %20 = arith.truncf %19 : vector<8x32xf32> to vector<8x32xbf16>
    %c0_14 = arith.constant 0 : index
    %c0_15 = arith.constant 0 : index
    %c0_16 = arith.constant 0 : index
    %21 = vector.load %arg4[%c0_14, %c0_15, %c0_16] : memref<1x8x8xf32, #tpu.memory_space<vmem>>, vector<1x8x8xf32>
    %22 = vector.shape_cast %21 : vector<1x8x8xf32> to vector<8x8xf32>
    %cst_17 = arith.constant 0.000000e+00 : f32
    %23 = vector.broadcast %cst_17 : f32 to vector<8x8xf32>
    %24 = arith.cmpf oeq, %22, %23 : vector<8x8xf32>
    %25 = vector.extract_strided_slice %16 {offsets = [0, 0], sizes = [8, 8], strides = [1, 1]} : vector<8x32xbf16> to vector<8x8xbf16>
    %26 = vector.extract_strided_slice %18 {offsets = [0, 0], sizes = [8, 8], strides = [1, 1]} : vector<8x32xbf16> to vector<8x8xbf16>
    %cst_18 = arith.constant dense<0.000000e+00> : vector<8x8xf32>
    %27 = tpu.matmul %25, %26, %cst_18 {dimension_numbers = #tpu.dot_dimension_numbers<[1], [1], [0], [0], [0, 0, 1, 0], [], []>} : vector<8x8xbf16>, vector<8x8xbf16>, vector<8x8xf32> -> vector<8x8xf32>
    %cst_19 = arith.constant -1.000000e+10 : f32
    %28 = vector.broadcast %cst_19 : f32 to vector<8x8xf32>
    %29 = arith.select %24, %28, %27 : vector<8x8xi1>, vector<8x8xf32>
    %cst_20 = arith.constant dense<0xFF800000> : vector<8xf32>
    %30 = vector.multi_reduction <maximumf>, %29, %cst_20 [1] : vector<8x8xf32> to vector<8xf32>
    %31 = vector.shape_cast %30 : vector<8xf32> to vector<8x1xf32>
    %32 = vector.broadcast %31 : vector<8x1xf32> to vector<8x8xf32>
    %33 = arith.subf %29, %32 : vector<8x8xf32>
    %34 = math.exp %33 : vector<8x8xf32>
    %cst_21 = arith.constant dense<0.000000e+00> : vector<8xf32>
    %35 = vector.multi_reduction <add>, %34, %cst_21 [1] : vector<8x8xf32> to vector<8xf32>
    %36 = vector.shape_cast %35 : vector<8xf32> to vector<8x1xf32>
    %37 = vector.broadcast %36 : vector<8x1xf32> to vector<8x8xf32>
    %38 = arith.divf %34, %37 : vector<8x8xf32>
    %39 = arith.truncf %38 : vector<8x8xf32> to vector<8x8xbf16>
    %40 = vector.extract_strided_slice %20 {offsets = [0, 0], sizes = [8, 8], strides = [1, 1]} : vector<8x32xbf16> to vector<8x8xbf16>
    %cst_22 = arith.constant dense<0.000000e+00> : vector<8x8xf32>
    %41 = tpu.matmul %39, %40, %cst_22 {dimension_numbers = #tpu.dot_dimension_numbers<[1], [0], [0], [1], [0, 0, 1, 1], [], []>} : vector<8x8xbf16>, vector<8x8xbf16>, vector<8x8xf32> -> vector<8x8xf32>
    %c0_23 = arith.constant 0 : index
    %c0_24 = arith.constant 0 : index
    %42 = vector.load %arg14[%c0_23, %c0_24] : memref<8x32xf32, #tpu.memory_space<vmem>>, vector<8x8xf32>
    tpu.vector_store %arg14[%c0_23, %c0_24], %41 {strides = array<i32>} : memref<8x32xf32, #tpu.memory_space<vmem>>, vector<8x8xf32>,
    %43 = vector.extract_strided_slice %16 {offsets = [0, 8], sizes = [8, 8], strides = [1, 1]} : vector<8x32xbf16> to vector<8x8xbf16>
    %44 = vector.extract_strided_slice %18 {offsets = [0, 8], sizes = [8, 8], strides = [1, 1]} : vector<8x32xbf16> to vector<8x8xbf16>
    %cst_25 = arith.constant dense<0.000000e+00> : vector<8x8xf32>
    %45 = tpu.matmul %43, %44, %cst_25 {dimension_numbers = #tpu.dot_dimension_numbers<[1], [1], [0], [0], [0, 0, 1, 0], [], []>} : vector<8x8xbf16>, vector<8x8xbf16>, vector<8x8xf32> -> vector<8x8xf32>
    %cst_26 = arith.constant -1.000000e+10 : f32
    %46 = vector.broadcast %cst_26 : f32 to vector<8x8xf32>
    %47 = arith.select %24, %46, %45 : vector<8x8xi1>, vector<8x8xf32>
    %cst_27 = arith.constant dense<0xFF800000> : vector<8xf32>
    %48 = vector.multi_reduction <maximumf>, %47, %cst_27 [1] : vector<8x8xf32> to vector<8xf32>
    %49 = vector.shape_cast %48 : vector<8xf32> to vector<8x1xf32>
    %50 = vector.broadcast %49 : vector<8x1xf32> to vector<8x8xf32>
    %51 = arith.subf %47, %50 : vector<8x8xf32>
    %52 = math.exp %51 : vector<8x8xf32>
    %cst_28 = arith.constant dense<0.000000e+00> : vector<8xf32>
    %53 = vector.multi_reduction <add>, %52, %cst_28 [1] : vector<8x8xf32> to vector<8xf32>
    %54 = vector.shape_cast %53 : vector<8xf32> to vector<8x1xf32>
    %55 = vector.broadcast %54 : vector<8x1xf32> to vector<8x8xf32>
    %56 = arith.divf %52, %55 : vector<8x8xf32>
    %57 = arith.truncf %56 : vector<8x8xf32> to vector<8x8xbf16>
    %58 = vector.extract_strided_slice %20 {offsets = [0, 8], sizes = [8, 8], strides = [1, 1]} : vector<8x32xbf16> to vector<8x8xbf16>
    %cst_29 = arith.constant dense<0.000000e+00> : vector<8x8xf32>
    %59 = tpu.matmul %57, %58, %cst_29 {dimension_numbers = #tpu.dot_dimension_numbers<[1], [0], [0], [1], [0, 0, 1, 1], [], []>} : vector<8x8xbf16>, vector<8x8xbf16>, vector<8x8xf32> -> vector<8x8xf32>
    %c0_30 = arith.constant 0 : index
    %c8 = arith.constant 8 : index
    %60 = vector.load %arg14[%c0_30, %c8] : memref<8x32xf32, #tpu.memory_space<vmem>>, vector<8x8xf32>
    tpu.vector_store %arg14[%c0_30, %c8], %59 {strides = array<i32>} : memref<8x32xf32, #tpu.memory_space<vmem>>, vector<8x8xf32>,
    %61 = vector.extract_strided_slice %16 {offsets = [0, 16], sizes = [8, 8], strides = [1, 1]} : vector<8x32xbf16> to vector<8x8xbf16>
    %62 = vector.extract_strided_slice %18 {offsets = [0, 16], sizes = [8, 8], strides = [1, 1]} : vector<8x32xbf16> to vector<8x8xbf16>
    %cst_31 = arith.constant dense<0.000000e+00> : vector<8x8xf32>
    %63 = tpu.matmul %61, %62, %cst_31 {dimension_numbers = #tpu.dot_dimension_numbers<[1], [1], [0], [0], [0, 0, 1, 0], [], []>} : vector<8x8xbf16>, vector<8x8xbf16>, vector<8x8xf32> -> vector<8x8xf32>
    %cst_32 = arith.constant -1.000000e+10 : f32
    %64 = vector.broadcast %cst_32 : f32 to vector<8x8xf32>
    %65 = arith.select %24, %64, %63 : vector<8x8xi1>, vector<8x8xf32>
    %cst_33 = arith.constant dense<0xFF800000> : vector<8xf32>
    %66 = vector.multi_reduction <maximumf>, %65, %cst_33 [1] : vector<8x8xf32> to vector<8xf32>
    %67 = vector.shape_cast %66 : vector<8xf32> to vector<8x1xf32>
    %68 = vector.broadcast %67 : vector<8x1xf32> to vector<8x8xf32>
    %69 = arith.subf %65, %68 : vector<8x8xf32>
    %70 = math.exp %69 : vector<8x8xf32>
    %cst_34 = arith.constant dense<0.000000e+00> : vector<8xf32>
    %71 = vector.multi_reduction <add>, %70, %cst_34 [1] : vector<8x8xf32> to vector<8xf32>
    %72 = vector.shape_cast %71 : vector<8xf32> to vector<8x1xf32>
    %73 = vector.broadcast %72 : vector<8x1xf32> to vector<8x8xf32>
    %74 = arith.divf %70, %73 : vector<8x8xf32>
    %75 = arith.truncf %74 : vector<8x8xf32> to vector<8x8xbf16>
    %76 = vector.extract_strided_slice %20 {offsets = [0, 16], sizes = [8, 8], strides = [1, 1]} : vector<8x32xbf16> to vector<8x8xbf16>
    %cst_35 = arith.constant dense<0.000000e+00> : vector<8x8xf32>
    %77 = tpu.matmul %75, %76, %cst_35 {dimension_numbers = #tpu.dot_dimension_numbers<[1], [0], [0], [1], [0, 0, 1, 1], [], []>} : vector<8x8xbf16>, vector<8x8xbf16>, vector<8x8xf32> -> vector<8x8xf32>
    %c0_36 = arith.constant 0 : index
    %c16 = arith.constant 16 : index
    %78 = vector.load %arg14[%c0_36, %c16] : memref<8x32xf32, #tpu.memory_space<vmem>>, vector<8x8xf32>
    tpu.vector_store %arg14[%c0_36, %c16], %77 {strides = array<i32>} : memref<8x32xf32, #tpu.memory_space<vmem>>, vector<8x8xf32>,
    %79 = vector.extract_strided_slice %16 {offsets = [0, 24], sizes = [8, 8], strides = [1, 1]} : vector<8x32xbf16> to vector<8x8xbf16>
    %80 = vector.extract_strided_slice %18 {offsets = [0, 24], sizes = [8, 8], strides = [1, 1]} : vector<8x32xbf16> to vector<8x8xbf16>
    %cst_37 = arith.constant dense<0.000000e+00> : vector<8x8xf32>
    %81 = tpu.matmul %79, %80, %cst_37 {dimension_numbers = #tpu.dot_dimension_numbers<[1], [1], [0], [0], [0, 0, 1, 0], [], []>} : vector<8x8xbf16>, vector<8x8xbf16>, vector<8x8xf32> -> vector<8x8xf32>
    %cst_38 = arith.constant -1.000000e+10 : f32
    %82 = vector.broadcast %cst_38 : f32 to vector<8x8xf32>
    %83 = arith.select %24, %82, %81 : vector<8x8xi1>, vector<8x8xf32>
    %cst_39 = arith.constant dense<0xFF800000> : vector<8xf32>
    %84 = vector.multi_reduction <maximumf>, %83, %cst_39 [1] : vector<8x8xf32> to vector<8xf32>
    %85 = vector.shape_cast %84 : vector<8xf32> to vector<8x1xf32>
    %86 = vector.broadcast %85 : vector<8x1xf32> to vector<8x8xf32>
    %87 = arith.subf %83, %86 : vector<8x8xf32>
    %88 = math.exp %87 : vector<8x8xf32>
    %cst_40 = arith.constant dense<0.000000e+00> : vector<8xf32>
    %89 = vector.multi_reduction <add>, %88, %cst_40 [1] : vector<8x8xf32> to vector<8xf32>
    %90 = vector.shape_cast %89 : vector<8xf32> to vector<8x1xf32>
    %91 = vector.broadcast %90 : vector<8x1xf32> to vector<8x8xf32>
    %92 = arith.divf %88, %91 : vector<8x8xf32>
    %93 = arith.truncf %92 : vector<8x8xf32> to vector<8x8xbf16>
    %94 = vector.extract_strided_slice %20 {offsets = [0, 24], sizes = [8, 8], strides = [1, 1]} : vector<8x32xbf16> to vector<8x8xbf16>
    %cst_41 = arith.constant dense<0.000000e+00> : vector<8x8xf32>
    %95 = tpu.matmul %93, %94, %cst_41 {dimension_numbers = #tpu.dot_dimension_numbers<[1], [0], [0], [1], [0, 0, 1, 1], [], []>} : vector<8x8xbf16>, vector<8x8xbf16>, vector<8x8xf32> -> vector<8x8xf32>
    %c0_42 = arith.constant 0 : index
    %c24 = arith.constant 24 : index
    %96 = vector.load %arg14[%c0_42, %c24] : memref<8x32xf32, #tpu.memory_space<vmem>>, vector<8x8xf32>
    tpu.vector_store %arg14[%c0_42, %c24], %95 {strides = array<i32>} : memref<8x32xf32, #tpu.memory_space<vmem>>, vector<8x8xf32>,
    %c0_43 = arith.constant 0 : index
    %c0_44 = arith.constant 0 : index
    %97 = vector.load %arg14[%c0_43, %c0_44] : memref<8x32xf32, #tpu.memory_space<vmem>>, vector<8x32xf32>
    %98 = arith.truncf %97 : vector<8x32xf32> to vector<8x32xbf16>
    %c0_45 = arith.constant 0 : index
    %c0_46 = arith.constant 0 : index
    %99 = vector.load %arg9[%c0_45, %c0_46] : memref<32x32xbf16, #tpu.memory_space<vmem>>, vector<32x32xbf16>
    %cst_47 = arith.constant dense<0.000000e+00> : vector<8x32xf32>
    %100 = tpu.matmul %98, %99, %cst_47 {dimension_numbers = #tpu.dot_dimension_numbers<[1], [0], [0], [1], [0, 0, 1, 1], [], []>} : vector<8x32xbf16>, vector<32x32xbf16>, vector<8x32xf32> -> vector<8x32xf32>
    %c0_48 = arith.constant 0 : index
    %c0_49 = arith.constant 0 : index
    %101 = vector.load %arg10[%c0_48, %c0_49] : memref<1x32xf32, #tpu.memory_space<vmem>>, vector<1x32xf32>
    %102 = vector.broadcast %101 : vector<1x32xf32> to vector<8x32xf32>
    %103 = arith.addf %100, %102 : vector<8x32xf32>
    %104 = arith.addf %1, %103 : vector<8x32xf32>
    %cst_50 = arith.constant dense<0.000000e+00> : vector<8xf32>
    %105 = vector.multi_reduction <add>, %104, %cst_50 [1] : vector<8x32xf32> to vector<8xf32>
    %106 = vector.shape_cast %105 : vector<8xf32> to vector<8x1xf32>
    %cst_51 = arith.constant 3.200000e+01 : f32
    %107 = vector.broadcast %cst_51 : f32 to vector<8x1xf32>
    %108 = arith.divf %106, %107 : vector<8x1xf32>
    %109 = vector.broadcast %108 : vector<8x1xf32> to vector<8x32xf32>
    %110 = arith.subf %104, %109 : vector<8x32xf32>
    %111 = arith.mulf %110, %110 : vector<8x32xf32>
    %cst_52 = arith.constant dense<0.000000e+00> : vector<8xf32>
    %112 = vector.multi_reduction <add>, %111, %cst_52 [1] : vector<8x32xf32> to vector<8xf32>
    %113 = vector.shape_cast %112 : vector<8xf32> to vector<8x1xf32>
    %cst_53 = arith.constant 3.200000e+01 : f32
    %114 = vector.broadcast %cst_53 : f32 to vector<8x1xf32>
    %115 = arith.divf %113, %114 : vector<8x1xf32>
    %116 = vector.broadcast %108 : vector<8x1xf32> to vector<8x32xf32>
    %117 = arith.subf %104, %116 : vector<8x32xf32>
    %cst_54 = arith.constant 9.99999974E-6 : f32
    %118 = vector.broadcast %cst_54 : f32 to vector<8x1xf32>
    %119 = arith.addf %115, %118 : vector<8x1xf32>
    %120 = math.rsqrt %119 : vector<8x1xf32>
    %121 = vector.broadcast %120 : vector<8x1xf32> to vector<8x32xf32>
    %122 = arith.mulf %117, %121 : vector<8x32xf32>
    %c0_55 = arith.constant 0 : index
    %c0_56 = arith.constant 0 : index
    %123 = vector.load %arg11[%c0_55, %c0_56] : memref<1x32xf32, #tpu.memory_space<vmem>>, vector<1x32xf32>
    %124 = vector.broadcast %123 : vector<1x32xf32> to vector<8x32xf32>
    %125 = arith.mulf %122, %124 : vector<8x32xf32>
    %c0_57 = arith.constant 0 : index
    %c0_58 = arith.constant 0 : index
    %126 = vector.load %arg12[%c0_57, %c0_58] : memref<1x32xf32, #tpu.memory_space<vmem>>, vector<1x32xf32>
    %127 = vector.broadcast %126 : vector<1x32xf32> to vector<8x32xf32>
    %128 = arith.addf %125, %127 : vector<8x32xf32>
    %c0_59 = arith.constant 0 : index
    %c0_60 = arith.constant 0 : index
    %c0_61 = arith.constant 0 : index
    %129 = vector.load %arg13[%c0_59, %c0_60, %c0_61] : memref<1x8x32xf32, #tpu.memory_space<vmem>>, vector<1x8x32xf32>
    %130 = vector.shape_cast %129 : vector<1x8x32xf32> to vector<8x32xf32>
    %131 = vector.shape_cast %128 : vector<8x32xf32> to vector<1x8x32xf32>
    tpu.vector_store %arg13[%c0_59, %c0_60, %c0_61], %131 {strides = array<i32>} : memref<1x8x32xf32, #tpu.memory_space<vmem>>, vector<1x8x32xf32>,
    return
  }
  func.func @transform_0(%arg0: i32, %arg1: i32) -> (i32, i32, i32) {
    %c0_i32 = arith.constant 0 : i32
    %c0_i32_0 = arith.constant 0 : i32
    return %arg0, %arg1, %c0_i32 : i32, i32, i32
  }
  func.func @transform_1(%arg0: i32, %arg1: i32) -> (i32, i32, i32) {
    %c0_i32 = arith.constant 0 : i32
    %c0_i32_0 = arith.constant 0 : i32
    %c0_i32_1 = arith.constant 0 : i32
    return %arg0, %c0_i32, %c0_i32_0 : i32, i32, i32
  }
  func.func @transform_2(%arg0: i32, %arg1: i32) -> (i32, i32, i32) {
    %c0_i32 = arith.constant 0 : i32
    %c0_i32_0 = arith.constant 0 : i32
    return %arg0, %arg1, %c0_i32 : i32, i32, i32
  }
  func.func @transform_3(%arg0: i32, %arg1: i32) -> (i32, i32) {
    %c0_i32 = arith.constant 0 : i32
    %c0_i32_0 = arith.constant 0 : i32
    %c0_i32_1 = arith.constant 0 : i32
    return %c0_i32, %c0_i32_0 : i32, i32
  }
  func.func @transform_4(%arg0: i32, %arg1: i32) -> (i32, i32) {
    %c0_i32 = arith.constant 0 : i32
    %c0_i32_0 = arith.constant 0 : i32
    %c0_i32_1 = arith.constant 0 : i32
    return %c0_i32, %c0_i32_0 : i32, i32
  }
  func.func @transform_5(%arg0: i32, %arg1: i32) -> (i32, i32) {
    %c0_i32 = arith.constant 0 : i32
    %c0_i32_0 = arith.constant 0 : i32
    %c0_i32_1 = arith.constant 0 : i32
    return %c0_i32, %c0_i32_0 : i32, i32
  }
  func.func @transform_6(%arg0: i32, %arg1: i32) -> (i32, i32) {
    %c0_i32 = arith.constant 0 : i32
    %c0_i32_0 = arith.constant 0 : i32
    %c0_i32_1 = arith.constant 0 : i32
    return %c0_i32, %c0_i32_0 : i32, i32
  }
  func.func @transform_7(%arg0: i32, %arg1: i32) -> (i32, i32) {
    %c0_i32 = arith.constant 0 : i32
    %c0_i32_0 = arith.constant 0 : i32
    %c0_i32_1 = arith.constant 0 : i32
    return %c0_i32, %c0_i32_0 : i32, i32
  }
  func.func @transform_8(%arg0: i32, %arg1: i32) -> (i32, i32) {
    %c0_i32 = arith.constant 0 : i32
    %c0_i32_0 = arith.constant 0 : i32
    %c0_i32_1 = arith.constant 0 : i32
    return %c0_i32, %c0_i32_0 : i32, i32
  }
  func.func @transform_9(%arg0: i32, %arg1: i32) -> (i32, i32) {
    %c0_i32 = arith.constant 0 : i32
    %c0_i32_0 = arith.constant 0 : i32
    %c0_i32_1 = arith.constant 0 : i32
    return %c0_i32, %c0_i32_0 : i32, i32
  }
  func.func @transform_10(%arg0: i32, %arg1: i32) -> (i32, i32) {
    %c0_i32 = arith.constant 0 : i32
    %c0_i32_0 = arith.constant 0 : i32
    %c0_i32_1 = arith.constant 0 : i32
    return %c0_i32, %c0_i32_0 : i32, i32
  }
  func.func @transform_11(%arg0: i32, %arg1: i32) -> (i32, i32, i32) {
    %c0_i32 = arith.constant 0 : i32
    %c0_i32_0 = arith.constant 0 : i32
    return %arg0, %arg1, %c0_i32 : i32, i32, i32
  }
}

module attributes {stable_mosaic.version = 11 : i64} {
  func.func @_mha_sublayer_kernel(%arg0: i32, %arg1: i32, %arg2: memref<1x8x32xf32, #tpu.memory_space<vmem>>, %arg3: memref<1x16x32xf32, #tpu.memory_space<vmem>>, %arg4: memref<1x1x16xf32, #tpu.memory_space<vmem>>, %arg5: memref<32x32xbf16, #tpu.memory_space<vmem>>, %arg6: memref<1x32xf32, #tpu.memory_space<vmem>>, %arg7: memref<32x64xbf16, #tpu.memory_space<vmem>>, %arg8: memref<1x64xf32, #tpu.memory_space<vmem>>, %arg9: memref<32x32xbf16, #tpu.memory_space<vmem>>, %arg10: memref<1x32xf32, #tpu.memory_space<vmem>>, %arg11: memref<1x32xf32, #tpu.memory_space<vmem>>, %arg12: memref<1x32xf32, #tpu.memory_space<vmem>>, %arg13: memref<1x8x32xf32, #tpu.memory_space<vmem>>, %arg14: memref<1x4x8x16xf32, #tpu.memory_space<vmem>>, %arg15: memref<8x32xf32, #tpu.memory_space<vmem>>) attributes {dimension_semantics = [#tpu.dimension_semantics<parallel>, #tpu.dimension_semantics<parallel>], iteration_bounds = array<i64: 2, 1>, scalar_prefetch = 0 : i64, scratch_operands = 1 : i64, tpu.core_type = #tpu.core_type<tc>, window_params = [{transform_indices = @transform_0, window_bounds = array<i64: 1, 8, 32>}, {transform_indices = @transform_1, window_bounds = array<i64: 1, 16, 32>}, {transform_indices = @transform_2, window_bounds = array<i64: 1, 1, 16>}, {pipeline_mode = #tpu.pipeline_mode<synchronous>, transform_indices = @transform_3, window_bounds = array<i64: 32, 32>}, {pipeline_mode = #tpu.pipeline_mode<synchronous>, transform_indices = @transform_4, window_bounds = array<i64: 1, 32>}, {pipeline_mode = #tpu.pipeline_mode<synchronous>, transform_indices = @transform_5, window_bounds = array<i64: 32, 64>}, {pipeline_mode = #tpu.pipeline_mode<synchronous>, transform_indices = @transform_6, window_bounds = array<i64: 1, 64>}, {pipeline_mode = #tpu.pipeline_mode<synchronous>, transform_indices = @transform_7, window_bounds = array<i64: 32, 32>}, {pipeline_mode = #tpu.pipeline_mode<synchronous>, transform_indices = @transform_8, window_bounds = array<i64: 1, 32>}, {pipeline_mode = #tpu.pipeline_mode<synchronous>, transform_indices = @transform_9, window_bounds = array<i64: 1, 32>}, {pipeline_mode = #tpu.pipeline_mode<synchronous>, transform_indices = @transform_10, window_bounds = array<i64: 1, 32>}, {transform_indices = @transform_11, window_bounds = array<i64: 1, 8, 32>}, {transform_indices = @transform_12, window_bounds = array<i64: 1, 4, 8, 16>}]} {
    %c0 = arith.constant 0 : index
    %c0_0 = arith.constant 0 : index
    %c0_1 = arith.constant 0 : index
    %0 = vector.load %arg2[%c0, %c0_0, %c0_1] : memref<1x8x32xf32, #tpu.memory_space<vmem>>, vector<1x8x32xf32>
    %1 = vector.shape_cast %0 : vector<1x8x32xf32> to vector<8x32xf32>
    %2 = arith.truncf %1 : vector<8x32xf32> to vector<8x32xbf16>
    %c0_2 = arith.constant 0 : index
    %c0_3 = arith.constant 0 : index
    %3 = vector.load %arg5[%c0_2, %c0_3] : memref<32x32xbf16, #tpu.memory_space<vmem>>, vector<32x32xbf16>
    %cst = arith.constant dense<0.000000e+00> : vector<8x32xf32>
    %4 = tpu.matmul %2, %3, %cst {dimension_numbers = #tpu.dot_dimension_numbers<[1], [0], [0], [1], [0, 0, 1, 1], [], []>} : vector<8x32xbf16>, vector<32x32xbf16>, vector<8x32xf32> -> vector<8x32xf32>
    %c0_4 = arith.constant 0 : index
    %c0_5 = arith.constant 0 : index
    %5 = vector.load %arg6[%c0_4, %c0_5] : memref<1x32xf32, #tpu.memory_space<vmem>>, vector<1x32xf32>
    %6 = vector.broadcast %5 : vector<1x32xf32> to vector<8x32xf32>
    %7 = arith.addf %4, %6 : vector<8x32xf32>
    %c0_6 = arith.constant 0 : index
    %c0_7 = arith.constant 0 : index
    %c0_8 = arith.constant 0 : index
    %8 = vector.load %arg3[%c0_6, %c0_7, %c0_8] : memref<1x16x32xf32, #tpu.memory_space<vmem>>, vector<1x16x32xf32>
    %9 = vector.shape_cast %8 : vector<1x16x32xf32> to vector<16x32xf32>
    %10 = arith.truncf %9 : vector<16x32xf32> to vector<16x32xbf16>
    %c0_9 = arith.constant 0 : index
    %c0_10 = arith.constant 0 : index
    %11 = vector.load %arg7[%c0_9, %c0_10] : memref<32x64xbf16, #tpu.memory_space<vmem>>, vector<32x64xbf16>
    %cst_11 = arith.constant dense<0.000000e+00> : vector<16x64xf32>
    %12 = tpu.matmul %10, %11, %cst_11 {dimension_numbers = #tpu.dot_dimension_numbers<[1], [0], [0], [1], [0, 0, 1, 1], [], []>} : vector<16x32xbf16>, vector<32x64xbf16>, vector<16x64xf32> -> vector<16x64xf32>
    %c0_12 = arith.constant 0 : index
    %c0_13 = arith.constant 0 : index
    %13 = vector.load %arg8[%c0_12, %c0_13] : memref<1x64xf32, #tpu.memory_space<vmem>>, vector<1x64xf32>
    %14 = vector.broadcast %13 : vector<1x64xf32> to vector<16x64xf32>
    %15 = arith.addf %12, %14 : vector<16x64xf32>
    %16 = arith.truncf %7 : vector<8x32xf32> to vector<8x32xbf16>
    %17 = vector.extract_strided_slice %15 {offsets = [0, 0], sizes = [16, 32], strides = [1, 1]} : vector<16x64xf32> to vector<16x32xf32>
    %18 = arith.truncf %17 : vector<16x32xf32> to vector<16x32xbf16>
    %19 = vector.extract_strided_slice %15 {offsets = [0, 32], sizes = [16, 32], strides = [1, 1]} : vector<16x64xf32> to vector<16x32xf32>
    %20 = arith.truncf %19 : vector<16x32xf32> to vector<16x32xbf16>
    %c0_14 = arith.constant 0 : index
    %c0_15 = arith.constant 0 : index
    %c0_16 = arith.constant 0 : index
    %21 = vector.load %arg4[%c0_14, %c0_15, %c0_16] : memref<1x1x16xf32, #tpu.memory_space<vmem>>, vector<1x1x16xf32>
    %22 = vector.shape_cast %21 : vector<1x1x16xf32> to vector<1x16xf32>
    %cst_17 = arith.constant 0.000000e+00 : f32
    %23 = vector.broadcast %cst_17 : f32 to vector<1x16xf32>
    %24 = arith.cmpf oeq, %22, %23 : vector<1x16xf32>
    %25 = vector.shape_cast %24 : vector<1x16xi1> to vector<1x16xi1>
    %26 = vector.broadcast %25 : vector<1x16xi1> to vector<8x16xi1>
    %27 = vector.extract_strided_slice %16 {offsets = [0, 0], sizes = [8, 8], strides = [1, 1]} : vector<8x32xbf16> to vector<8x8xbf16>
    %28 = vector.extract_strided_slice %18 {offsets = [0, 0], sizes = [16, 8], strides = [1, 1]} : vector<16x32xbf16> to vector<16x8xbf16>
    %cst_18 = arith.constant dense<0.000000e+00> : vector<8x16xf32>
    %29 = tpu.matmul %27, %28, %cst_18 {dimension_numbers = #tpu.dot_dimension_numbers<[1], [1], [0], [0], [0, 0, 1, 0], [], []>} : vector<8x8xbf16>, vector<16x8xbf16>, vector<8x16xf32> -> vector<8x16xf32>
    %cst_19 = arith.constant -1.000000e+10 : f32
    %30 = vector.broadcast %cst_19 : f32 to vector<8x16xf32>
    %31 = arith.select %26, %30, %29 : vector<8x16xi1>, vector<8x16xf32>
    %cst_20 = arith.constant dense<0xFF800000> : vector<8xf32>
    %32 = vector.multi_reduction <maximumf>, %31, %cst_20 [1] : vector<8x16xf32> to vector<8xf32>
    %33 = vector.shape_cast %32 : vector<8xf32> to vector<8x1xf32>
    %34 = vector.broadcast %33 : vector<8x1xf32> to vector<8x16xf32>
    %35 = arith.subf %31, %34 : vector<8x16xf32>
    %36 = math.exp %35 : vector<8x16xf32>
    %cst_21 = arith.constant dense<0.000000e+00> : vector<8xf32>
    %37 = vector.multi_reduction <add>, %36, %cst_21 [1] : vector<8x16xf32> to vector<8xf32>
    %38 = vector.shape_cast %37 : vector<8xf32> to vector<8x1xf32>
    %39 = vector.broadcast %38 : vector<8x1xf32> to vector<8x16xf32>
    %40 = arith.divf %36, %39 : vector<8x16xf32>
    %c0_22 = arith.constant 0 : index
    %c0_23 = arith.constant 0 : index
    %c0_24 = arith.constant 0 : index
    %c0_25 = arith.constant 0 : index
    %41 = vector.load %arg14[%c0_22, %c0_23, %c0_24, %c0_25] : memref<1x4x8x16xf32, #tpu.memory_space<vmem>>, vector<1x1x8x16xf32>
    %42 = vector.shape_cast %41 : vector<1x1x8x16xf32> to vector<8x16xf32>
    %43 = vector.shape_cast %40 : vector<8x16xf32> to vector<1x1x8x16xf32>
    tpu.vector_store %arg14[%c0_22, %c0_23, %c0_24, %c0_25], %43 {strides = array<i32>} : memref<1x4x8x16xf32, #tpu.memory_space<vmem>>, vector<1x1x8x16xf32>,
    %44 = arith.truncf %40 : vector<8x16xf32> to vector<8x16xbf16>
    %45 = vector.extract_strided_slice %20 {offsets = [0, 0], sizes = [16, 8], strides = [1, 1]} : vector<16x32xbf16> to vector<16x8xbf16>
    %cst_26 = arith.constant dense<0.000000e+00> : vector<8x8xf32>
    %46 = tpu.matmul %44, %45, %cst_26 {dimension_numbers = #tpu.dot_dimension_numbers<[1], [0], [0], [1], [0, 0, 1, 1], [], []>} : vector<8x16xbf16>, vector<16x8xbf16>, vector<8x8xf32> -> vector<8x8xf32>
    %c0_27 = arith.constant 0 : index
    %c0_28 = arith.constant 0 : index
    %47 = vector.load %arg15[%c0_27, %c0_28] : memref<8x32xf32, #tpu.memory_space<vmem>>, vector<8x8xf32>
    tpu.vector_store %arg15[%c0_27, %c0_28], %46 {strides = array<i32>} : memref<8x32xf32, #tpu.memory_space<vmem>>, vector<8x8xf32>,
    %48 = vector.extract_strided_slice %16 {offsets = [0, 8], sizes = [8, 8], strides = [1, 1]} : vector<8x32xbf16> to vector<8x8xbf16>
    %49 = vector.extract_strided_slice %18 {offsets = [0, 8], sizes = [16, 8], strides = [1, 1]} : vector<16x32xbf16> to vector<16x8xbf16>
    %cst_29 = arith.constant dense<0.000000e+00> : vector<8x16xf32>
    %50 = tpu.matmul %48, %49, %cst_29 {dimension_numbers = #tpu.dot_dimension_numbers<[1], [1], [0], [0], [0, 0, 1, 0], [], []>} : vector<8x8xbf16>, vector<16x8xbf16>, vector<8x16xf32> -> vector<8x16xf32>
    %cst_30 = arith.constant -1.000000e+10 : f32
    %51 = vector.broadcast %cst_30 : f32 to vector<8x16xf32>
    %52 = arith.select %26, %51, %50 : vector<8x16xi1>, vector<8x16xf32>
    %cst_31 = arith.constant dense<0xFF800000> : vector<8xf32>
    %53 = vector.multi_reduction <maximumf>, %52, %cst_31 [1] : vector<8x16xf32> to vector<8xf32>
    %54 = vector.shape_cast %53 : vector<8xf32> to vector<8x1xf32>
    %55 = vector.broadcast %54 : vector<8x1xf32> to vector<8x16xf32>
    %56 = arith.subf %52, %55 : vector<8x16xf32>
    %57 = math.exp %56 : vector<8x16xf32>
    %cst_32 = arith.constant dense<0.000000e+00> : vector<8xf32>
    %58 = vector.multi_reduction <add>, %57, %cst_32 [1] : vector<8x16xf32> to vector<8xf32>
    %59 = vector.shape_cast %58 : vector<8xf32> to vector<8x1xf32>
    %60 = vector.broadcast %59 : vector<8x1xf32> to vector<8x16xf32>
    %61 = arith.divf %57, %60 : vector<8x16xf32>
    %c0_33 = arith.constant 0 : index
    %c1 = arith.constant 1 : index
    %c0_34 = arith.constant 0 : index
    %c0_35 = arith.constant 0 : index
    %62 = vector.load %arg14[%c0_33, %c1, %c0_34, %c0_35] : memref<1x4x8x16xf32, #tpu.memory_space<vmem>>, vector<1x1x8x16xf32>
    %63 = vector.shape_cast %62 : vector<1x1x8x16xf32> to vector<8x16xf32>
    %64 = vector.shape_cast %61 : vector<8x16xf32> to vector<1x1x8x16xf32>
    tpu.vector_store %arg14[%c0_33, %c1, %c0_34, %c0_35], %64 {strides = array<i32>} : memref<1x4x8x16xf32, #tpu.memory_space<vmem>>, vector<1x1x8x16xf32>,
    %65 = arith.truncf %61 : vector<8x16xf32> to vector<8x16xbf16>
    %66 = vector.extract_strided_slice %20 {offsets = [0, 8], sizes = [16, 8], strides = [1, 1]} : vector<16x32xbf16> to vector<16x8xbf16>
    %cst_36 = arith.constant dense<0.000000e+00> : vector<8x8xf32>
    %67 = tpu.matmul %65, %66, %cst_36 {dimension_numbers = #tpu.dot_dimension_numbers<[1], [0], [0], [1], [0, 0, 1, 1], [], []>} : vector<8x16xbf16>, vector<16x8xbf16>, vector<8x8xf32> -> vector<8x8xf32>
    %c0_37 = arith.constant 0 : index
    %c8 = arith.constant 8 : index
    %68 = vector.load %arg15[%c0_37, %c8] : memref<8x32xf32, #tpu.memory_space<vmem>>, vector<8x8xf32>
    tpu.vector_store %arg15[%c0_37, %c8], %67 {strides = array<i32>} : memref<8x32xf32, #tpu.memory_space<vmem>>, vector<8x8xf32>,
    %69 = vector.extract_strided_slice %16 {offsets = [0, 16], sizes = [8, 8], strides = [1, 1]} : vector<8x32xbf16> to vector<8x8xbf16>
    %70 = vector.extract_strided_slice %18 {offsets = [0, 16], sizes = [16, 8], strides = [1, 1]} : vector<16x32xbf16> to vector<16x8xbf16>
    %cst_38 = arith.constant dense<0.000000e+00> : vector<8x16xf32>
    %71 = tpu.matmul %69, %70, %cst_38 {dimension_numbers = #tpu.dot_dimension_numbers<[1], [1], [0], [0], [0, 0, 1, 0], [], []>} : vector<8x8xbf16>, vector<16x8xbf16>, vector<8x16xf32> -> vector<8x16xf32>
    %cst_39 = arith.constant -1.000000e+10 : f32
    %72 = vector.broadcast %cst_39 : f32 to vector<8x16xf32>
    %73 = arith.select %26, %72, %71 : vector<8x16xi1>, vector<8x16xf32>
    %cst_40 = arith.constant dense<0xFF800000> : vector<8xf32>
    %74 = vector.multi_reduction <maximumf>, %73, %cst_40 [1] : vector<8x16xf32> to vector<8xf32>
    %75 = vector.shape_cast %74 : vector<8xf32> to vector<8x1xf32>
    %76 = vector.broadcast %75 : vector<8x1xf32> to vector<8x16xf32>
    %77 = arith.subf %73, %76 : vector<8x16xf32>
    %78 = math.exp %77 : vector<8x16xf32>
    %cst_41 = arith.constant dense<0.000000e+00> : vector<8xf32>
    %79 = vector.multi_reduction <add>, %78, %cst_41 [1] : vector<8x16xf32> to vector<8xf32>
    %80 = vector.shape_cast %79 : vector<8xf32> to vector<8x1xf32>
    %81 = vector.broadcast %80 : vector<8x1xf32> to vector<8x16xf32>
    %82 = arith.divf %78, %81 : vector<8x16xf32>
    %c0_42 = arith.constant 0 : index
    %c2 = arith.constant 2 : index
    %c0_43 = arith.constant 0 : index
    %c0_44 = arith.constant 0 : index
    %83 = vector.load %arg14[%c0_42, %c2, %c0_43, %c0_44] : memref<1x4x8x16xf32, #tpu.memory_space<vmem>>, vector<1x1x8x16xf32>
    %84 = vector.shape_cast %83 : vector<1x1x8x16xf32> to vector<8x16xf32>
    %85 = vector.shape_cast %82 : vector<8x16xf32> to vector<1x1x8x16xf32>
    tpu.vector_store %arg14[%c0_42, %c2, %c0_43, %c0_44], %85 {strides = array<i32>} : memref<1x4x8x16xf32, #tpu.memory_space<vmem>>, vector<1x1x8x16xf32>,
    %86 = arith.truncf %82 : vector<8x16xf32> to vector<8x16xbf16>
    %87 = vector.extract_strided_slice %20 {offsets = [0, 16], sizes = [16, 8], strides = [1, 1]} : vector<16x32xbf16> to vector<16x8xbf16>
    %cst_45 = arith.constant dense<0.000000e+00> : vector<8x8xf32>
    %88 = tpu.matmul %86, %87, %cst_45 {dimension_numbers = #tpu.dot_dimension_numbers<[1], [0], [0], [1], [0, 0, 1, 1], [], []>} : vector<8x16xbf16>, vector<16x8xbf16>, vector<8x8xf32> -> vector<8x8xf32>
    %c0_46 = arith.constant 0 : index
    %c16 = arith.constant 16 : index
    %89 = vector.load %arg15[%c0_46, %c16] : memref<8x32xf32, #tpu.memory_space<vmem>>, vector<8x8xf32>
    tpu.vector_store %arg15[%c0_46, %c16], %88 {strides = array<i32>} : memref<8x32xf32, #tpu.memory_space<vmem>>, vector<8x8xf32>,
    %90 = vector.extract_strided_slice %16 {offsets = [0, 24], sizes = [8, 8], strides = [1, 1]} : vector<8x32xbf16> to vector<8x8xbf16>
    %91 = vector.extract_strided_slice %18 {offsets = [0, 24], sizes = [16, 8], strides = [1, 1]} : vector<16x32xbf16> to vector<16x8xbf16>
    %cst_47 = arith.constant dense<0.000000e+00> : vector<8x16xf32>
    %92 = tpu.matmul %90, %91, %cst_47 {dimension_numbers = #tpu.dot_dimension_numbers<[1], [1], [0], [0], [0, 0, 1, 0], [], []>} : vector<8x8xbf16>, vector<16x8xbf16>, vector<8x16xf32> -> vector<8x16xf32>
    %cst_48 = arith.constant -1.000000e+10 : f32
    %93 = vector.broadcast %cst_48 : f32 to vector<8x16xf32>
    %94 = arith.select %26, %93, %92 : vector<8x16xi1>, vector<8x16xf32>
    %cst_49 = arith.constant dense<0xFF800000> : vector<8xf32>
    %95 = vector.multi_reduction <maximumf>, %94, %cst_49 [1] : vector<8x16xf32> to vector<8xf32>
    %96 = vector.shape_cast %95 : vector<8xf32> to vector<8x1xf32>
    %97 = vector.broadcast %96 : vector<8x1xf32> to vector<8x16xf32>
    %98 = arith.subf %94, %97 : vector<8x16xf32>
    %99 = math.exp %98 : vector<8x16xf32>
    %cst_50 = arith.constant dense<0.000000e+00> : vector<8xf32>
    %100 = vector.multi_reduction <add>, %99, %cst_50 [1] : vector<8x16xf32> to vector<8xf32>
    %101 = vector.shape_cast %100 : vector<8xf32> to vector<8x1xf32>
    %102 = vector.broadcast %101 : vector<8x1xf32> to vector<8x16xf32>
    %103 = arith.divf %99, %102 : vector<8x16xf32>
    %c0_51 = arith.constant 0 : index
    %c3 = arith.constant 3 : index
    %c0_52 = arith.constant 0 : index
    %c0_53 = arith.constant 0 : index
    %104 = vector.load %arg14[%c0_51, %c3, %c0_52, %c0_53] : memref<1x4x8x16xf32, #tpu.memory_space<vmem>>, vector<1x1x8x16xf32>
    %105 = vector.shape_cast %104 : vector<1x1x8x16xf32> to vector<8x16xf32>
    %106 = vector.shape_cast %103 : vector<8x16xf32> to vector<1x1x8x16xf32>
    tpu.vector_store %arg14[%c0_51, %c3, %c0_52, %c0_53], %106 {strides = array<i32>} : memref<1x4x8x16xf32, #tpu.memory_space<vmem>>, vector<1x1x8x16xf32>,
    %107 = arith.truncf %103 : vector<8x16xf32> to vector<8x16xbf16>
    %108 = vector.extract_strided_slice %20 {offsets = [0, 24], sizes = [16, 8], strides = [1, 1]} : vector<16x32xbf16> to vector<16x8xbf16>
    %cst_54 = arith.constant dense<0.000000e+00> : vector<8x8xf32>
    %109 = tpu.matmul %107, %108, %cst_54 {dimension_numbers = #tpu.dot_dimension_numbers<[1], [0], [0], [1], [0, 0, 1, 1], [], []>} : vector<8x16xbf16>, vector<16x8xbf16>, vector<8x8xf32> -> vector<8x8xf32>
    %c0_55 = arith.constant 0 : index
    %c24 = arith.constant 24 : index
    %110 = vector.load %arg15[%c0_55, %c24] : memref<8x32xf32, #tpu.memory_space<vmem>>, vector<8x8xf32>
    tpu.vector_store %arg15[%c0_55, %c24], %109 {strides = array<i32>} : memref<8x32xf32, #tpu.memory_space<vmem>>, vector<8x8xf32>,
    %c0_56 = arith.constant 0 : index
    %c0_57 = arith.constant 0 : index
    %111 = vector.load %arg15[%c0_56, %c0_57] : memref<8x32xf32, #tpu.memory_space<vmem>>, vector<8x32xf32>
    %112 = arith.truncf %111 : vector<8x32xf32> to vector<8x32xbf16>
    %c0_58 = arith.constant 0 : index
    %c0_59 = arith.constant 0 : index
    %113 = vector.load %arg9[%c0_58, %c0_59] : memref<32x32xbf16, #tpu.memory_space<vmem>>, vector<32x32xbf16>
    %cst_60 = arith.constant dense<0.000000e+00> : vector<8x32xf32>
    %114 = tpu.matmul %112, %113, %cst_60 {dimension_numbers = #tpu.dot_dimension_numbers<[1], [0], [0], [1], [0, 0, 1, 1], [], []>} : vector<8x32xbf16>, vector<32x32xbf16>, vector<8x32xf32> -> vector<8x32xf32>
    %c0_61 = arith.constant 0 : index
    %c0_62 = arith.constant 0 : index
    %115 = vector.load %arg10[%c0_61, %c0_62] : memref<1x32xf32, #tpu.memory_space<vmem>>, vector<1x32xf32>
    %116 = vector.broadcast %115 : vector<1x32xf32> to vector<8x32xf32>
    %117 = arith.addf %114, %116 : vector<8x32xf32>
    %118 = arith.addf %1, %117 : vector<8x32xf32>
    %cst_63 = arith.constant dense<0.000000e+00> : vector<8xf32>
    %119 = vector.multi_reduction <add>, %118, %cst_63 [1] : vector<8x32xf32> to vector<8xf32>
    %120 = vector.shape_cast %119 : vector<8xf32> to vector<8x1xf32>
    %cst_64 = arith.constant 3.200000e+01 : f32
    %121 = vector.broadcast %cst_64 : f32 to vector<8x1xf32>
    %122 = arith.divf %120, %121 : vector<8x1xf32>
    %123 = vector.broadcast %122 : vector<8x1xf32> to vector<8x32xf32>
    %124 = arith.subf %118, %123 : vector<8x32xf32>
    %125 = arith.mulf %124, %124 : vector<8x32xf32>
    %cst_65 = arith.constant dense<0.000000e+00> : vector<8xf32>
    %126 = vector.multi_reduction <add>, %125, %cst_65 [1] : vector<8x32xf32> to vector<8xf32>
    %127 = vector.shape_cast %126 : vector<8xf32> to vector<8x1xf32>
    %cst_66 = arith.constant 3.200000e+01 : f32
    %128 = vector.broadcast %cst_66 : f32 to vector<8x1xf32>
    %129 = arith.divf %127, %128 : vector<8x1xf32>
    %130 = vector.broadcast %122 : vector<8x1xf32> to vector<8x32xf32>
    %131 = arith.subf %118, %130 : vector<8x32xf32>
    %cst_67 = arith.constant 9.99999974E-6 : f32
    %132 = vector.broadcast %cst_67 : f32 to vector<8x1xf32>
    %133 = arith.addf %129, %132 : vector<8x1xf32>
    %134 = math.rsqrt %133 : vector<8x1xf32>
    %135 = vector.broadcast %134 : vector<8x1xf32> to vector<8x32xf32>
    %136 = arith.mulf %131, %135 : vector<8x32xf32>
    %c0_68 = arith.constant 0 : index
    %c0_69 = arith.constant 0 : index
    %137 = vector.load %arg11[%c0_68, %c0_69] : memref<1x32xf32, #tpu.memory_space<vmem>>, vector<1x32xf32>
    %138 = vector.broadcast %137 : vector<1x32xf32> to vector<8x32xf32>
    %139 = arith.mulf %136, %138 : vector<8x32xf32>
    %c0_70 = arith.constant 0 : index
    %c0_71 = arith.constant 0 : index
    %140 = vector.load %arg12[%c0_70, %c0_71] : memref<1x32xf32, #tpu.memory_space<vmem>>, vector<1x32xf32>
    %141 = vector.broadcast %140 : vector<1x32xf32> to vector<8x32xf32>
    %142 = arith.addf %139, %141 : vector<8x32xf32>
    %c0_72 = arith.constant 0 : index
    %c0_73 = arith.constant 0 : index
    %c0_74 = arith.constant 0 : index
    %143 = vector.load %arg13[%c0_72, %c0_73, %c0_74] : memref<1x8x32xf32, #tpu.memory_space<vmem>>, vector<1x8x32xf32>
    %144 = vector.shape_cast %143 : vector<1x8x32xf32> to vector<8x32xf32>
    %145 = vector.shape_cast %142 : vector<8x32xf32> to vector<1x8x32xf32>
    tpu.vector_store %arg13[%c0_72, %c0_73, %c0_74], %145 {strides = array<i32>} : memref<1x8x32xf32, #tpu.memory_space<vmem>>, vector<1x8x32xf32>,
    return
  }
  func.func @transform_0(%arg0: i32, %arg1: i32) -> (i32, i32, i32) {
    %c0_i32 = arith.constant 0 : i32
    %c0_i32_0 = arith.constant 0 : i32
    return %arg0, %arg1, %c0_i32 : i32, i32, i32
  }
  func.func @transform_1(%arg0: i32, %arg1: i32) -> (i32, i32, i32) {
    %c0_i32 = arith.constant 0 : i32
    %c0_i32_0 = arith.constant 0 : i32
    %c0_i32_1 = arith.constant 0 : i32
    return %arg0, %c0_i32, %c0_i32_0 : i32, i32, i32
  }
  func.func @transform_2(%arg0: i32, %arg1: i32) -> (i32, i32, i32) {
    %c0_i32 = arith.constant 0 : i32
    %c0_i32_0 = arith.constant 0 : i32
    %c0_i32_1 = arith.constant 0 : i32
    return %arg0, %c0_i32, %c0_i32_0 : i32, i32, i32
  }
  func.func @transform_3(%arg0: i32, %arg1: i32) -> (i32, i32) {
    %c0_i32 = arith.constant 0 : i32
    %c0_i32_0 = arith.constant 0 : i32
    %c0_i32_1 = arith.constant 0 : i32
    return %c0_i32, %c0_i32_0 : i32, i32
  }
  func.func @transform_4(%arg0: i32, %arg1: i32) -> (i32, i32) {
    %c0_i32 = arith.constant 0 : i32
    %c0_i32_0 = arith.constant 0 : i32
    %c0_i32_1 = arith.constant 0 : i32
    return %c0_i32, %c0_i32_0 : i32, i32
  }
  func.func @transform_5(%arg0: i32, %arg1: i32) -> (i32, i32) {
    %c0_i32 = arith.constant 0 : i32
    %c0_i32_0 = arith.constant 0 : i32
    %c0_i32_1 = arith.constant 0 : i32
    return %c0_i32, %c0_i32_0 : i32, i32
  }
  func.func @transform_6(%arg0: i32, %arg1: i32) -> (i32, i32) {
    %c0_i32 = arith.constant 0 : i32
    %c0_i32_0 = arith.constant 0 : i32
    %c0_i32_1 = arith.constant 0 : i32
    return %c0_i32, %c0_i32_0 : i32, i32
  }
  func.func @transform_7(%arg0: i32, %arg1: i32) -> (i32, i32) {
    %c0_i32 = arith.constant 0 : i32
    %c0_i32_0 = arith.constant 0 : i32
    %c0_i32_1 = arith.constant 0 : i32
    return %c0_i32, %c0_i32_0 : i32, i32
  }
  func.func @transform_8(%arg0: i32, %arg1: i32) -> (i32, i32) {
    %c0_i32 = arith.constant 0 : i32
    %c0_i32_0 = arith.constant 0 : i32
    %c0_i32_1 = arith.constant 0 : i32
    return %c0_i32, %c0_i32_0 : i32, i32
  }
  func.func @transform_9(%arg0: i32, %arg1: i32) -> (i32, i32) {
    %c0_i32 = arith.constant 0 : i32
    %c0_i32_0 = arith.constant 0 : i32
    %c0_i32_1 = arith.constant 0 : i32
    return %c0_i32, %c0_i32_0 : i32, i32
  }
  func.func @transform_10(%arg0: i32, %arg1: i32) -> (i32, i32) {
    %c0_i32 = arith.constant 0 : i32
    %c0_i32_0 = arith.constant 0 : i32
    %c0_i32_1 = arith.constant 0 : i32
    return %c0_i32, %c0_i32_0 : i32, i32
  }
  func.func @transform_11(%arg0: i32, %arg1: i32) -> (i32, i32, i32) {
    %c0_i32 = arith.constant 0 : i32
    %c0_i32_0 = arith.constant 0 : i32
    return %arg0, %arg1, %c0_i32 : i32, i32, i32
  }
  func.func @transform_12(%arg0: i32, %arg1: i32) -> (i32, i32, i32, i32) {
    %c0_i32 = arith.constant 0 : i32
    %c0_i32_0 = arith.constant 0 : i32
    %c0_i32_1 = arith.constant 0 : i32
    return %arg0, %c0_i32, %arg1, %c0_i32_0 : i32, i32, i32, i32
  }
}

module attributes {stable_mosaic.version = 11 : i64} {
  func.func @_ffn_add_ln_kernel(%arg0: i32, %arg1: i32, %arg2: memref<16x32xf32, #tpu.memory_space<vmem>>, %arg3: memref<32x64xbf16, #tpu.memory_space<vmem>>, %arg4: memref<1x64xf32, #tpu.memory_space<vmem>>, %arg5: memref<64x32xbf16, #tpu.memory_space<vmem>>, %arg6: memref<1x32xf32, #tpu.memory_space<vmem>>, %arg7: memref<1x32xf32, #tpu.memory_space<vmem>>, %arg8: memref<1x32xf32, #tpu.memory_space<vmem>>, %arg9: memref<16x32xf32, #tpu.memory_space<vmem>>, %arg10: memref<16x32xf32, #tpu.memory_space<vmem>>) attributes {dimension_semantics = [#tpu.dimension_semantics<parallel>, #tpu.dimension_semantics<arbitrary>], iteration_bounds = array<i64: 1, 1>, scalar_prefetch = 0 : i64, scratch_operands = 1 : i64, tpu.core_type = #tpu.core_type<tc>, window_params = [{transform_indices = @transform_0, window_bounds = array<i64: 16, 32>}, {transform_indices = @transform_1, window_bounds = array<i64: 32, 64>}, {transform_indices = @transform_2, window_bounds = array<i64: 1, 64>}, {transform_indices = @transform_3, window_bounds = array<i64: 64, 32>}, {pipeline_mode = #tpu.pipeline_mode<synchronous>, transform_indices = @transform_4, window_bounds = array<i64: 1, 32>}, {pipeline_mode = #tpu.pipeline_mode<synchronous>, transform_indices = @transform_5, window_bounds = array<i64: 1, 32>}, {pipeline_mode = #tpu.pipeline_mode<synchronous>, transform_indices = @transform_6, window_bounds = array<i64: 1, 32>}, {transform_indices = @transform_7, window_bounds = array<i64: 16, 32>}]} {
    %c0_i32 = arith.constant 0 : i32
    %0 = arith.cmpi eq, %arg1, %c0_i32 : i32
    %1 = arith.extui %0 : i1 to i32
    %c0_i32_0 = arith.constant 0 : i32
    %2 = arith.cmpi ne, %1, %c0_i32_0 : i32
    scf.if %2 {
      %cst_16 = arith.constant 0.000000e+00 : f32
      %21 = vector.broadcast %cst_16 : f32 to vector<16x32xf32>
      %c0_17 = arith.constant 0 : index
      %c0_18 = arith.constant 0 : index
      %22 = vector.load %arg10[%c0_17, %c0_18] : memref<16x32xf32, #tpu.memory_space<vmem>>, vector<16x32xf32>
      tpu.vector_store %arg10[%c0_17, %c0_18], %21 {strides = array<i32>} : memref<16x32xf32, #tpu.memory_space<vmem>>, vector<16x32xf32>,
    } else {
    }
    %c0 = arith.constant 0 : index
    %c0_1 = arith.constant 0 : index
    %3 = vector.load %arg2[%c0, %c0_1] : memref<16x32xf32, #tpu.memory_space<vmem>>, vector<16x32xf32>
    %4 = arith.truncf %3 : vector<16x32xf32> to vector<16x32xbf16>
    %c0_2 = arith.constant 0 : index
    %c0_3 = arith.constant 0 : index
    %5 = vector.load %arg3[%c0_2, %c0_3] : memref<32x64xbf16, #tpu.memory_space<vmem>>, vector<32x64xbf16>
    %cst = arith.constant dense<0.000000e+00> : vector<16x64xf32>
    %6 = tpu.matmul %4, %5, %cst {dimension_numbers = #tpu.dot_dimension_numbers<[1], [0], [0], [1], [0, 0, 1, 1], [], []>} : vector<16x32xbf16>, vector<32x64xbf16>, vector<16x64xf32> -> vector<16x64xf32>
    %c0_4 = arith.constant 0 : index
    %c0_5 = arith.constant 0 : index
    %7 = vector.load %arg4[%c0_4, %c0_5] : memref<1x64xf32, #tpu.memory_space<vmem>>, vector<1x64xf32>
    %8 = vector.broadcast %7 : vector<1x64xf32> to vector<16x64xf32>
    %9 = arith.addf %6, %8 : vector<16x64xf32>
    %cst_6 = arith.constant 0.000000e+00 : f32
    %10 = vector.broadcast %cst_6 : f32 to vector<16x64xf32>
    %11 = arith.maximumf %9, %10 : vector<16x64xf32>
    %c0_7 = arith.constant 0 : index
    %c0_8 = arith.constant 0 : index
    %12 = vector.load %arg10[%c0_7, %c0_8] : memref<16x32xf32, #tpu.memory_space<vmem>>, vector<16x32xf32>
    %13 = arith.truncf %11 : vector<16x64xf32> to vector<16x64xbf16>
    %c0_9 = arith.constant 0 : index
    %c0_10 = arith.constant 0 : index
    %14 = vector.load %arg5[%c0_9, %c0_10] : memref<64x32xbf16, #tpu.memory_space<vmem>>, vector<64x32xbf16>
    %cst_11 = arith.constant dense<0.000000e+00> : vector<16x32xf32>
    %15 = tpu.matmul %13, %14, %cst_11 {dimension_numbers = #tpu.dot_dimension_numbers<[1], [0], [0], [1], [0, 0, 1, 1], [], []>} : vector<16x64xbf16>, vector<64x32xbf16>, vector<16x32xf32> -> vector<16x32xf32>
    %16 = arith.addf %12, %15 : vector<16x32xf32>
    %c0_12 = arith.constant 0 : index
    %c0_13 = arith.constant 0 : index
    %17 = vector.load %arg10[%c0_12, %c0_13] : memref<16x32xf32, #tpu.memory_space<vmem>>, vector<16x32xf32>
    tpu.vector_store %arg10[%c0_12, %c0_13], %16 {strides = array<i32>} : memref<16x32xf32, #tpu.memory_space<vmem>>, vector<16x32xf32>,
    %c0_i32_14 = arith.constant 0 : i32
    %18 = arith.cmpi eq, %arg1, %c0_i32_14 : i32
    %19 = arith.extui %18 : i1 to i32
    %c0_i32_15 = arith.constant 0 : i32
    %20 = arith.cmpi ne, %19, %c0_i32_15 : i32
    scf.if %20 {
      %c0_16 = arith.constant 0 : index
      %c0_17 = arith.constant 0 : index
      %21 = vector.load %arg10[%c0_16, %c0_17] : memref<16x32xf32, #tpu.memory_space<vmem>>, vector<16x32xf32>
      %22 = arith.addf %3, %21 : vector<16x32xf32>
      %c0_18 = arith.constant 0 : index
      %c0_19 = arith.constant 0 : index
      %23 = vector.load %arg6[%c0_18, %c0_19] : memref<1x32xf32, #tpu.memory_space<vmem>>, vector<1x32xf32>
      %24 = vector.broadcast %23 : vector<1x32xf32> to vector<16x32xf32>
      %25 = arith.addf %22, %24 : vector<16x32xf32>
      %cst_20 = arith.constant dense<0.000000e+00> : vector<16xf32>
      %26 = vector.multi_reduction <add>, %25, %cst_20 [1] : vector<16x32xf32> to vector<16xf32>
      %27 = vector.shape_cast %26 : vector<16xf32> to vector<16x1xf32>
      %cst_21 = arith.constant 3.200000e+01 : f32
      %28 = vector.broadcast %cst_21 : f32 to vector<16x1xf32>
      %29 = arith.divf %27, %28 : vector<16x1xf32>
      %30 = vector.broadcast %29 : vector<16x1xf32> to vector<16x32xf32>
      %31 = arith.subf %25, %30 : vector<16x32xf32>
      %32 = arith.mulf %31, %31 : vector<16x32xf32>
      %cst_22 = arith.constant dense<0.000000e+00> : vector<16xf32>
      %33 = vector.multi_reduction <add>, %32, %cst_22 [1] : vector<16x32xf32> to vector<16xf32>
      %34 = vector.shape_cast %33 : vector<16xf32> to vector<16x1xf32>
      %cst_23 = arith.constant 3.200000e+01 : f32
      %35 = vector.broadcast %cst_23 : f32 to vector<16x1xf32>
      %36 = arith.divf %34, %35 : vector<16x1xf32>
      %37 = vector.broadcast %29 : vector<16x1xf32> to vector<16x32xf32>
      %38 = arith.subf %25, %37 : vector<16x32xf32>
      %cst_24 = arith.constant 9.99999974E-6 : f32
      %39 = vector.broadcast %cst_24 : f32 to vector<16x1xf32>
      %40 = arith.addf %36, %39 : vector<16x1xf32>
      %41 = math.rsqrt %40 : vector<16x1xf32>
      %42 = vector.broadcast %41 : vector<16x1xf32> to vector<16x32xf32>
      %43 = arith.mulf %38, %42 : vector<16x32xf32>
      %c0_25 = arith.constant 0 : index
      %c0_26 = arith.constant 0 : index
      %44 = vector.load %arg7[%c0_25, %c0_26] : memref<1x32xf32, #tpu.memory_space<vmem>>, vector<1x32xf32>
      %45 = vector.broadcast %44 : vector<1x32xf32> to vector<16x32xf32>
      %46 = arith.mulf %43, %45 : vector<16x32xf32>
      %c0_27 = arith.constant 0 : index
      %c0_28 = arith.constant 0 : index
      %47 = vector.load %arg8[%c0_27, %c0_28] : memref<1x32xf32, #tpu.memory_space<vmem>>, vector<1x32xf32>
      %48 = vector.broadcast %47 : vector<1x32xf32> to vector<16x32xf32>
      %49 = arith.addf %46, %48 : vector<16x32xf32>
      %c0_29 = arith.constant 0 : index
      %c0_30 = arith.constant 0 : index
      %50 = vector.load %arg9[%c0_29, %c0_30] : memref<16x32xf32, #tpu.memory_space<vmem>>, vector<16x32xf32>
      tpu.vector_store %arg9[%c0_29, %c0_30], %49 {strides = array<i32>} : memref<16x32xf32, #tpu.memory_space<vmem>>, vector<16x32xf32>,
    } else {
    }
    return
  }
  func.func @transform_0(%arg0: i32, %arg1: i32) -> (i32, i32) {
    %c0_i32 = arith.constant 0 : i32
    %c0_i32_0 = arith.constant 0 : i32
    return %arg0, %c0_i32 : i32, i32
  }
  func.func @transform_1(%arg0: i32, %arg1: i32) -> (i32, i32) {
    %c0_i32 = arith.constant 0 : i32
    %c0_i32_0 = arith.constant 0 : i32
    return %c0_i32, %arg1 : i32, i32
  }
  func.func @transform_2(%arg0: i32, %arg1: i32) -> (i32, i32) {
    %c0_i32 = arith.constant 0 : i32
    %c0_i32_0 = arith.constant 0 : i32
    return %c0_i32, %arg1 : i32, i32
  }
  func.func @transform_3(%arg0: i32, %arg1: i32) -> (i32, i32) {
    %c0_i32 = arith.constant 0 : i32
    %c0_i32_0 = arith.constant 0 : i32
    return %arg1, %c0_i32 : i32, i32
  }
  func.func @transform_4(%arg0: i32, %arg1: i32) -> (i32, i32) {
    %c0_i32 = arith.constant 0 : i32
    %c0_i32_0 = arith.constant 0 : i32
    %c0_i32_1 = arith.constant 0 : i32
    return %c0_i32, %c0_i32_0 : i32, i32
  }
  func.func @transform_5(%arg0: i32, %arg1: i32) -> (i32, i32) {
    %c0_i32 = arith.constant 0 : i32
    %c0_i32_0 = arith.constant 0 : i32
    %c0_i32_1 = arith.constant 0 : i32
    return %c0_i32, %c0_i32_0 : i32, i32
  }
  func.func @transform_6(%arg0: i32, %arg1: i32) -> (i32, i32) {
    %c0_i32 = arith.constant 0 : i32
    %c0_i32_0 = arith.constant 0 : i32
    %c0_i32_1 = arith.constant 0 : i32
    return %c0_i32, %c0_i32_0 : i32, i32
  }
  func.func @transform_7(%arg0: i32, %arg1: i32) -> (i32, i32) {
    %c0_i32 = arith.constant 0 : i32
    %c0_i32_0 = arith.constant 0 : i32
    return %arg0, %c0_i32 : i32, i32
  }
}

</mosaic_0001>

<bundles_post_ra>
// kernel: decoder_layer_forward.5
= control target key start
LH: loop header
LB: loop body
LE: loop exit
PB: predicated region body
PF: predicated region fallthrough
CT: control target
= control target key end

     0   :  { %v350_v1 = vmov 0.0   ;;  %vm351_vm0 = vmmov 0   ;;  %vm32_vm1 = vcmask 261120   ;;  %s454_s0 = inlined_call_operand.vmem [shape: f32[16,32], index: 0, kind: input, shape index: {}]   ;;  %s455_s1 = inlined_call_operand.vmem [shape: bf16[32,64], index: 1, kind: input, shape index: {}]   ;;  %s456_s2 = inlined_call_operand.vmem [shape: f32[1,64], index: 2, kind: input, shape index: {}]   ;;  %s457_s3 = inlined_call_operand.vmem [shape: bf16[64,32], index: 3, kind: input, shape index: {}]   ;;  %s458_s4 = inlined_call_operand.vmem [shape: f32[1,32], index: 4, kind: input, shape index: {}]   ;;  %s459_s5 = inlined_call_operand.vmem [shape: f32[1,32], index: 5, kind: input, shape index: {}]   ;;  %s460_s6 = inlined_call_operand.vmem [shape: f32[1,32], index: 6, kind: input, shape index: {}]   ;;  %s461_s7 = inlined_call_operand.hbm [shape: f32[16,32], index: 7, kind: output, shape index: {}]  }
   0x1   :  { %v316_v0 = vld [vmem:[%s455_s1] sm:$0xff]   ;;  %291 = vmatprep.subr.bf16.mxu0 %v350_v1  ;;  %v317_v2 = vld [vmem:[%s455_s1 + $0x8] sm:$0xff]   ;;  %299 = vmatprep.subr.bf16.mxu1 %v350_v1  ;;  %33 = vst.msk [vmem:[#allocation2] sm:$0xff] %vm32_vm1, %v350_v1  ;;  %34 = vst.msk [vmem:[#allocation2 + $0x8] sm:$0xff] %vm32_vm1, %v350_v1 }
   0x2   :  { %292 = vmatpush3.bf16.msra.mxu0 %v316_v0  ;;  %295 = vmatprep.mubr.msk.bf16.mxu0 %vm351_vm0, %v350_v1  ;;  %v35_v3 = vld [vmem:[%s454_s0] sm:$0xff]  ;;  %v36_v4 = vld [vmem:[%s454_s0 + $0x8] sm:$0xff] }
   0x3   :  { %293 = vmatprep.subr.bf16.mxu0 %v350_v1  ;;  %v318_v5 = vld [vmem:[%s457_s3] sm:$0xff]   ;;  %307 = vmatprep.mubr.msk.bf16.mxu1 %vm351_vm0, %v350_v1  ;;  %v319_v6 = vld [vmem:[%s457_s3 + $0x8] sm:$0xff]   ;;  %v37_v7 = vpack.c.bf16 %v36_v4, %v35_v3 }
   0x4   :  { %300 = vmatpush3.bf16.msra.mxu1 %v318_v5 }
   0x5   :  { %301 = vmatprep.subr.bf16.mxu1 %v350_v1 }
   0x6   :  { %294 = vmatpush3.bf16.msra.mxu0 %v317_v2 }
   0x7   :  { %12 = vsyncpa [#allocation4], 0  ;;  %v320_v8 = vld [vmem:[%s457_s3 + $0x10] sm:$0xff]   ;;  %v321_v9 = vld [vmem:[%s457_s3 + $0x18] sm:$0xff]   ;;  %vm143_vm2 = vcmask 523264   ;;  %s352_s20 = smov [#allocation3]  }
   0x8   :  { %302 = vmatpush3.bf16.msra.mxu1 %v319_v6  ;;  %v271_v10 = vld [vmem:[%s456_s2] ss:$0 sm:$0xff]  ;;  %v109_v22 = vld [vmem:[#allocation2 + $0x8] sm:$0xff]  ;;  %s260_s21 = sshll.u32 %s352_s20, 4  ;;  %s261_s21 = int_to_ptr.vmem [resolvable:$true] %s260_s21 }
   0x9   :  { %296 = vmatmul.mubr.msk.bf16.vlgmr.msra.gmra.mrb[0].mxu0 %vm32_vm1, %v37_v7  ;;  %303 = vmatprep.subr.bf16.mxu1 %v350_v1  ;;  %v108_v20 = vld [vmem:[#allocation2] sm:$0xff]  ;;  %s326_s22 = scalar_lea.vmem %s261_s21, 256  ;;  %p331_p1 = scmp.lt.s32.totalorder %s261_s21, %s261_s21 }
   0xa   :  { %v280_v29 = vld [vmem:[%s458_s4] ss:$0 sm:$0xff]  ;;  %p327_p0 = scmp.ne.s32.totalorder %s261_s21, %s326_s22  ;;  %p332_p2 = scmp.lt.s32.totalorder %s326_s22, %s326_s22 }
   0xb   :  { %v281_v54 = vld [vmem:[%s459_s5] ss:$0 sm:$0xff] }
   0xc   :  { %304 = vmatpush3.bf16.msra.mxu1 %v320_v8  ;;  %v282_v56 = vld [vmem:[%s460_s6] ss:$0 sm:$0xff]  ;;  %p333_p3 = por %p332_p2, %p331_p1 }
   0xd   :  { %305 = vmatprep.subr.bf16.mxu1 %v350_v1 }
   0xe   :  { %p334_p4 = pnand %p333_p3, %p327_p0 }
  0x10   :  { %306 = vmatpush3.bf16.msra.mxu1 %v321_v9 }
  0xdc   :  { %v99_v11 = vpop.f32.mrb[0].mxu0 }
  0xdd   :  { %v100_v12 = vadd.f32 %v271_v10, %v99_v11  ;;  %v297_v13 = vpop.f32.mrb[1].mxu0 }
  0xde   :  { %v102_v14 = vpop.f32.mrb[2].mxu0 }
  0xdf   :  { %v103_v15 = vadd.f32 %v271_v10, %v102_v14  ;;  %v298_v16 = vpop.f32.mrb[3].mxu0  ;;  %v106_v17 = vmax.f32 %v100_v12, 0.0 }
  0xe1   :  { %v107_v18 = vmax.f32 %v103_v15, 0.0 }
  0xe3   :  { %v110_v19 = vpack.c.bf16 %v107_v18, %v106_v17 }
  0xe5   :  { %308 = vmatmul.mubr.msk.bf16.vlgmr.msra.gmra.mrb[0].mxu1 %vm143_vm2, %v110_v19 }
 0x1b8   :  { %v181_v21 = vpop.f32.mrb[0].mxu1 }
 0x1b9   :  { %v188_v23 = vadd.f32 %v181_v21, %v108_v20  ;;  %v309_v24 = vpop.f32.mrb[1].mxu1 }
 0x1ba   :  { %v184_v25 = vpop.f32.mrb[2].mxu1 }
 0x1bb   :  { %190 = vst.msk [vmem:[#allocation2] sm:$0xff] %vm32_vm1, %v188_v23  ;;  %v189_v26 = vadd.f32 %v184_v25, %v109_v22  ;;  %v310_v27 = vpop.f32.mrb[3].mxu1 }
 0x1bd   :  { %191 = vst.msk [vmem:[#allocation2 + $0x8] sm:$0xff] %vm32_vm1, %v189_v26 }
 0x1c2   :  { %v195_v28 = vld [vmem:[#allocation2] sm:$0xff] }
 0x1c3   :  { %v197_v30 = vadd.f32 %v195_v28, %v35_v3 }
 0x1c4   :  { %v196_v31 = vld [vmem:[#allocation2 + $0x8] sm:$0xff] }
 0x1c5   :  { %v206_v32 = vadd.f32 %v280_v29, %v197_v30  ;;  %v198_v33 = vadd.f32 %v196_v31, %v36_v4 }
 0x1c7   :  { %v208_v34 = vsel %vm32_vm1, %v206_v32, 0.0  ;;  %v207_v35 = vadd.f32 %v280_v29, %v198_v33 }
 0x1c8   :  { %209 = vadd.xlane.f32.xlu0 %v208_v34 }
 0x1c9   :  { %v211_v36 = vsel %vm32_vm1, %v207_v35, 0.0 }
 0x1cc   :  { %212 = vadd.xlane.f32.xlu0 %v211_v36 }
 0x255   :  { %v210_v37 = vpop.xlane.xlu0 %209 }
 0x256   :  { %v215_v38 = vmul.f32 0.03125, %v210_v37 }
 0x258   :  { %v217_v39 = vsub.f32 %v206_v32, %v215_v38 }
 0x259   :  { %v213_v40 = vpop.xlane.xlu0 %212 }
 0x25a   :  { %v216_v41 = vmul.f32 0.03125, %v213_v40  ;;  %v219_v42 = vmul.f32 %v217_v39, %v217_v39 }
 0x25c   :  { %v218_v43 = vsub.f32 %v207_v35, %v216_v41  ;;  %v221_v44 = vsel %vm32_vm1, %v219_v42, 0.0 }
 0x25d   :  { %222 = vadd.xlane.f32.xlu1 %v221_v44 }
 0x25e   :  { %v220_v45 = vmul.f32 %v218_v43, %v218_v43 }
 0x260   :  { %v224_v46 = vsel %vm32_vm1, %v220_v45, 0.0 }
 0x261   :  { %225 = vadd.xlane.f32.xlu1 %v224_v46 }
 0x2ea   :  { %v223_v47 = vpop.xlane.xlu1 %222 }
 0x2eb   :  { %v227_v48 = vmul.f32 0.03125, %v223_v47 }
 0x2ed   :  { %v229_v49 = vadd.f32 1e-05, %v227_v48 }
 0x2ee   :  { %v226_v50 = vpop.xlane.xlu1 %225 }
 0x2ef   :  { %322 = vrsqrt.f32 %v229_v49  ;;  %v228_v51 = vmul.f32 0.03125, %v226_v50 }
 0x2f1   :  { %v230_v52 = vadd.f32 1e-05, %v228_v51 }
 0x2f3   :  { %324 = vrsqrt.f32 %v230_v52 }
 0x2f9   :  { %v323_v53 = vpop.eup %322 }
 0x2fa   :  { %v233_v55 = vmul.f32 %v323_v53, %v217_v39 }
 0x2fc   :  { %v242_v57 = vmul.f32 %v281_v54, %v233_v55 }
 0x2fd   :  { %v325_v58 = vpop.eup %324 }
 0x2fe   :  { %v234_v59 = vmul.f32 %v325_v58, %v218_v43  ;;  %v251_v60 = vadd.f32 %v282_v56, %v242_v57 }
 0x300   :  { %v243_v61 = vmul.f32 %v281_v54, %v234_v59  ;;  %253 = vst.msk [vmem:[#allocation3] sm:$0xff] %vm32_vm1, %v251_v60 }
 0x302   :  { %v252_v62 = vadd.f32 %v282_v56, %v243_v61 }
 0x304   :  { %254 = vst.msk [vmem:[#allocation3 + $0x8] sm:$0xff] %vm32_vm1, %v252_v62 }
 0x305   :  { %337 = shalt.err (!%p334_p4)
}
 0x306   :  { %s338_s23 = scalar_lea.hbm %s461_s7, 256 }
 0x307   :  { %p339_p5 = scmp.ne.s32.totalorder %s461_s7, %s338_s23  ;;  %p342_p6 = scmp.lt.u32.totalorder %s338_s23, %s461_s7 }
 0x309   :  { %p344_p7 = pnand %p342_p6, %p339_p5 }
 0x30b   :  { %347 = shalt.err (!%p344_p7)
}
 0x30c   :  { %s353_s28 = smov 128   ;;  %s354_s29 = smov 8  }
 0x30d   :  { %266 = dma.vmem_to_hbm [thread:$0]  %s261_s21, 256, %s461_s7, [#allocation4], %s353_s28, %s353_s28, %s354_s29  }
 0x30e   :  { %348 = dma.done.wait [#allocation4], 256  }
 0x30f   :  { %349 = vsyncadd [#allocation4], 4294967040 }
 0x310   :  { %270 = vsyncpa [#allocation4], 1 }

// kernel: decoder_layer_forward.4
= control target key start
LH: loop header
LB: loop body
LE: loop exit
PB: predicated region body
PF: predicated region fallthrough
CT: control target
= control target key end

     0   :  { %s2008_s0 = inlined_call_operand.vmem [shape: f32[2,8,32], index: 0, kind: input, shape index: {}]   ;;  %s2009_s1 = inlined_call_operand.vmem [shape: f32[2,16,32], index: 1, kind: input, shape index: {}]   ;;  %s2010_s2 = inlined_call_operand.vmem [shape: f32[2,1,16], index: 2, kind: input, shape index: {}]   ;;  %s2011_s3 = inlined_call_operand.vmem [shape: bf16[32,32], index: 3, kind: input, shape index: {}]   ;;  %s2012_s4 = inlined_call_operand.vmem [shape: f32[1,32], index: 4, kind: input, shape index: {}]   ;;  %s2013_s5 = inlined_call_operand.vmem [shape: bf16[32,64], index: 5, kind: input, shape index: {}]   ;;  %s2014_s6 = inlined_call_operand.vmem [shape: f32[1,64], index: 6, kind: input, shape index: {}]   ;;  %s2015_s7 = inlined_call_operand.vmem [shape: bf16[32,32], index: 7, kind: input, shape index: {}]   ;;  %s2016_s8 = inlined_call_operand.vmem [shape: f32[1,32], index: 8, kind: input, shape index: {}]   ;;  %s2017_s9 = inlined_call_operand.vmem [shape: f32[1,32], index: 9, kind: input, shape index: {}]   ;;  %s2018_s10 = inlined_call_operand.vmem [shape: f32[1,32], index: 10, kind: input, shape index: {}]   ;;  %s2019_s11 = inlined_call_operand.vmem [shape: f32[2,8,32], index: 11, kind: output, shape index: {0}]   ;;  %s2020_s12 = inlined_call_operand.hbm [shape: f32[2,4,8,16], index: 12, kind: output, shape index: {1}]  }
   0x1   :  { %2025 = sst [smem:[#allocation8_spill]] %s2013_s5 }
   0x2   :  { %18 = vsyncpa [#allocation4], 0 }
   0x3   :  { %20 = vsyncpa [#allocation4 + $0x1], 0  ;;  %s1743_s21 = smov 0   ;;  %s1745_s22 = smov 0  }
   0x4   :  { %s1747_s23 = smov 0   ;;  %s1749_s24 = smov 0  }
   0x5   :  { %s1751_s25 = smov 0   ;;  %s1753_s26 = smov 0  }
   0x6 LB: > { %2026 = sst [smem:[#allocation6_spill]] %s1657_s25  ;;  %s1351_s27 = sadd.s32 4294967295, %s1661_s26   ;;  %s1661_s26 = sphi %s1753_s26, %s26_s26   ;;  %s1657_s25 = sphi %s1751_s25, %s2034_s25   ;;  %s1653_s24 = sphi %s1749_s24, %s2033_s24   ;;  %s1649_s23 = sphi %s1747_s23, %s2037_s23   ;;  %s1645_s22 = sphi %s1745_s22, %s2036_s22   ;;  %s1641_s21 = sphi %s1743_s21, %s2035_s21  }
   0x7   : > { %s1352_s28 = sadd.s32 4294967294, %s1661_s26   ;;  %s38_s29 = sadd.s32 1, %s1657_s25 }
   0x8   : > { %s323_s30 = sadd.s32 1, %s1649_s23  ;;  %p40_p0 = scmp.ge.s32.totalorder %s38_s29, 2 }
   0x9   : > { %p333_p1 = scmp.ne.s32.totalorder %s1649_s23, %s1645_s22  ;;  %p334_p2 = scmp.eq.s32.totalorder %s1351_s27, 1 }
   0xa   : > { %p339_p3 = scmp.ne.s32.totalorder %s1645_s22, %s1641_s21  ;;  %s2039_s29 = smov (%p40_p0, %s38_s29), 0 }
   0xb   : > { %2027 = sst [smem:[#allocation7_spill]] %s2039_s29  ;;  %p1783_p4 = por %p334_p2, %p333_p1 }
   0xc   : > { %p340_p5 = scmp.eq.s32.totalorder %s1352_s28, 1  ;;  %s318_s14 = ssub.s32 %s1657_s25, %s2039_s29 }
   0xd   : > { %p1355_p6 = scmp.ge.s32.totalorder %s1661_s26, 1  ;;  %p321_p7 = scmp.eq.s32.totalorder %s318_s14, 0 }
   0xe   : > { %p1790_p8 = por %p340_p5, %p339_p3  ;;  %p406_p9 = scmp.lt.s32.totalorder %s1661_s26, 3 }
   0xf   : > { %s1796_s16 = scalar_select %p321_p7, %s1649_s23, %s323_s30  }
  0x10   : > { %p407_p10 = pnand %p1355_p6, %p406_p9 }
  0x11   : > { %s2030_s5 = sld [smem:[#allocation8_spill]] (!%p407_p10)  ;;  %v1663_v1 = vmov (!%p407_p10), 0.0   ;;  %v1561_v3 = vld [vmem:[%s2011_s3] sm:$0xff] (!%p407_p10)   ;;  %vm1664_vm0 = vmmov (!%p407_p10), 0   ;;  %p465_p11 = scmp.lt.s32.totalorder (!%p407_p10), %s1653_s24, 1  ;;  %v1562_v4 = vld [vmem:[%s2011_s3 + $0x8] sm:$0xff] (!%p407_p10)   ;;  %v632_v35 = vlaneseq (!%p407_p10) }
  0x12   : > { %410 = sbr.rel (%p407_p10) target bundleno = 1793 (0x701), region = 64  ;;  %1426 = vmatprep.subr.bf16.mxu1 (!%p407_p10), %v1663_v1  ;;  %1418 = vmatprep.subr.bf16.mxu0 (!%p407_p10), %v1663_v1  ;;  %vm513_vm1 = vcmask (!%p407_p10), 261120   ;;  %v1365_v10 = vld [vmem:[%s2014_s6] ss:$0 sm:$0xff] (!%p407_p10)  ;;  %vm637_vm2 = vcmask (!%p407_p10), 64512   ;;  %s1665_s17 = smov (!%p407_p10), 112  }
  0x13   : > { %1430 = vmatprep.mubr.msk.bf16.mxu1 (!%p407_p10), %vm1664_vm0, %v1663_v1  ;;  %1422 = vmatprep.mubr.msk.bf16.mxu0 (!%p407_p10), %vm1664_vm0, %v1663_v1  ;;  %v1361_v12 = vld [vmem:[%s2012_s4] ss:$0 sm:$0xff] (!%p407_p10)  ;;  %s1667_s20 = smov (!%p407_p10), 104   ;;  %v633_v37 = vshrl.u32 (!%p407_p10), %v632_v35, 7  ;;  %v1668_v39 = vmov (!%p407_p10), 0   ;;  %vm685_vm5 = vcmask (!%p407_p10), 130048  }
  0x14   : > { %1419 = vmatpush3.bf16.msra.mxu0 (!%p407_p10), %v1561_v3  ;;  %s1669_s29 = smov (!%p407_p10), 96   ;;  %s1671_s14 = smov (!%p407_p10), 72   ;;  %vm863_vm6 = vcmask (!%p407_p10), 130112   ;;  %vm980_vm7 = vcmask (!%p407_p10), 195712   ;;  %vm1097_vm8 = vcmask (!%p407_p10), 261312  }
  0x15   : > { %1420 = vmatprep.subr.bf16.mxu0 (!%p407_p10), %v1663_v1  ;;  %v634_v38 = vsub.s32 (!%p407_p10), 0, %v633_v37 }
  0x17   : > { %v1559_v0 = vld [vmem:[%s2030_s5] sm:$0xff] (!%p407_p10)   ;;  %v1560_v2 = vld [vmem:[%s2030_s5 + $0x8] sm:$0xff] (!%p407_p10)  }
  0x18   : > { %1427 = vmatpush3.bf16.msra.mxu1 (!%p407_p10), %v1559_v0  ;;  %1421 = vmatpush3.bf16.msra.mxu0 (!%p407_p10), %v1562_v4 }
  0x19   : > { %1428 = vmatprep.subr.bf16.mxu1 %v1663_v1  ;;  %s1816_s30 = scalar_select %p465_p11, %s1653_s24, 1  ;;  %1434 = vmatprep.subr.bf16.mxu0 %v1663_v1 }
  0x1b   : > { %s1391_s18 = sshll.u32 %s1816_s30, 4  ;;  %s2023_s19 = sshll.u32 %s1816_s30, 3 }
  0x1c   : > { %1429 = vmatpush3.bf16.msra.mxu1 %v1560_v2  ;;  %s476_s28 = scalar_lea.vmem %s2009_s1, %s1391_s18  ;;  %s471_s25 = scalar_lea.vmem %s2008_s0, %s2023_s19 }
  0x1d   : > { %1440 = vmatprep.subr.bf16.mxu1 %v1663_v1  ;;  %v557_v5 = vld [vmem:[%s476_s28] sm:$0xff]  ;;  %v558_v6 = vld [vmem:[%s476_s28 + $0x8] sm:$0xff]  ;;  %s1666_s18 = smov 120   ;;  %s479_s5 = scalar_lea.vmem %s2010_s2, %s1816_s30 }
  0x1e   : > { %v1833_v7 = vld [vmem:[%s471_s25] sm:$0xff]  ;;  %v559_v8 = vpack.c.bf16 %v558_v6, %v557_v5  ;;  %s1670_s25 = smov 80   ;;  %s2024_s28 = smov 8  }
  0x1f   : > { %v489_v9 = vpack.c.bf16 %v1833_v7, %v1833_v7  ;;  %v629_v36 = vld [vmem:[%s479_s5] sm:$0x1] }
  0x20   : > { %1431 = vmatmul.mubr.msk.bf16.vlgmr.msra.gmra.mrb[0].mxu1 %vm513_vm1, %v559_v8  ;;  %vm630_vm3 = vcmp.eq.f32.partialorder %v629_v36, 0.0 }
  0x21   : > { %1423 = vmatmul.mubr.msk.bf16.vlgmr.msra.gmra.mrb[0].mxu0 %vm513_vm1, %v489_v9  ;;  %1442 = vmatprep.mubr.msk.bf16.mxu1 %vm1664_vm0, %v1663_v1  ;;  %v631_v40 = vsel %vm630_vm3, 1, %v1668_v39 }
  0x22   : > { %1436 = vmatprep.mubr.msk.bf16.mxu0 %vm1664_vm0, %v1663_v1  ;;  %v635_v41 = vrot.slane %v631_v40, %v634_v38 }
  0x24   : > { %vm636_vm4 = vcmp.eq.s32.totalorder %v635_v41, 1 }
  0xf3   : > { %v620_v11 = vpop.f32.mrb[0].mxu1 }
  0xf4   : > { %v551_v13 = vpop.f32.mrb[0].mxu0  ;;  %v1432_v14 = vpop.f32.mrb[1].mxu1  ;;  %v621_v18 = vadd.f32 %v1365_v10, %v620_v11 }
  0xf5   : > { %v1424_v15 = vpop.f32.mrb[1].mxu0  ;;  %v623_v16 = vpop.f32.mrb[2].mxu1  ;;  %v552_v21 = vadd.f32 %v1361_v12, %v551_v13 }
  0xf6   : > { %v554_v17 = vpop.f32.mrb[2].mxu0  ;;  %v624_v19 = vadd.f32 %v1365_v10, %v623_v16  ;;  %v1433_v20 = vpop.f32.mrb[3].mxu1 }
  0xf7   : > { %v1425_v22 = vpop.f32.mrb[3].mxu0  ;;  %v627_v24 = vpack.c.bf16 %v552_v21, %v552_v21 }
  0xf8   : > { %v1850_v23 = vpack.c.bf16 %v624_v19, %v621_v18 }
  0xfa   : > { %867 = vrot.lane.b32.xlu1 %v1850_v23, %s1665_s17  ;;  %750 = vrot.lane.b32.xlu0 %v1850_v23, %s1666_s18  ;;  %v642_v25 = vsel %vm637_vm2, %v1850_v23, 0 }
  0xfb   : > { %1435 = vmatpush3.bf16.xpose.msra.mxu0 %v642_v25 }
  0xfc   : > { %1446 = vmatprep.subr.bf16.mxu0 %v1663_v1 }
  0xfe   : > { %865 = vrot.lane.b32.xlu1 %v627_v24, %s1665_s17  ;;  %748 = vrot.lane.b32.xlu0 %v627_v24, %s1666_s18  ;;  %s462_s17 = sand.u32 1, %s1645_s22  }
  0xff   : > { %s1356_s18 = sshll.u32 %s462_s17, 5 }
 0x100   : > { %s1900_s27 = scalar_lea.vmem [#allocation3], %s1356_s18  ;;  %s1674_s18 = smov 16  }
 0x102   : > { %982 = vrot.lane.b32.xlu1 %v627_v24, %s1667_s20  ;;  %984 = vrot.lane.b32.xlu0 %v1850_v23, %s1667_s20  ;;  %s1672_s20 = smov 88  }
 0x103   : > { %1437 = vmatmul.mubr.msk.bf16.vlgmr.msra.gmra.mrb[4].mxu0 %vm637_vm2, %v627_v24 }
 0x104   : > { %1448 = vmatprep.mubr.msk.bf16.mxu0 %vm1664_vm0, %v1663_v1 }
 0x16c   : > { %v751_v26 = vpop.permute.xlu0 %750  ;;  %v868_v28 = vpop.permute.xlu1 %867 }
 0x16d   : > { %v756_v27 = vsel %vm637_vm2, %v751_v26, 0  ;;  %v873_v30 = vsel %vm637_vm2, %v868_v28, 0 }
 0x16e   : > { %1447 = vmatpush3.bf16.xpose.msra.mxu0 %v756_v27 }
 0x16f   : > { %1458 = vmatprep.subr.bf16.mxu0 %v1663_v1 }
 0x170   : > { %v749_v29 = vpop.permute.xlu0 %748  ;;  %v866_v32 = vpop.permute.xlu1 %865 }
 0x174   : > { %v985_v31 = vpop.permute.xlu0 %984  ;;  %v983_v34 = vpop.permute.xlu1 %982 }
 0x175   : > { %1449 = vmatmul.mubr.msk.bf16.vlgmr.msra.gmra.mrb[8].mxu0 %vm637_vm2, %v749_v29  ;;  %v990_v33 = vsel %vm637_vm2, %v985_v31, 0 }
 0x176   : > { %1459 = vmatpush3.bf16.xpose.msra.mxu0 %v873_v30  ;;  %1460 = vmatprep.mubr.msk.bf16.mxu0 %vm1664_vm0, %v1663_v1 }
 0x177   : > { %1470 = vmatprep.subr.bf16.mxu0 %v1663_v1 }
 0x17d   : > { %1461 = vmatmul.mubr.msk.bf16.vlgmr.msra.gmra.mrb[12].mxu0 %vm637_vm2, %v866_v32 }
 0x17e   : > { %1471 = vmatpush3.bf16.xpose.msra.mxu0 %v990_v33  ;;  %1472 = vmatprep.mubr.msk.bf16.mxu0 %vm1664_vm0, %v1663_v1 }
 0x17f   : > { %1482 = vmatprep.subr.bf16.mxu0 %v1663_v1 }
 0x185   : > { %1473 = vmatmul.mubr.msk.bf16.vlgmr.msra.gmra.mrb[16].mxu0 %vm637_vm2, %v983_v34 }
 0x186   : > { %1486 = vmatprep.mubr.msk.bf16.mxu0 %vm1664_vm0, %v1663_v1 }
 0x1d6   : > { %v678_v42 = vpop.f32.mrb[4].mxu0 }
 0x1d7   : > { %v684_v43 = vsel %vm636_vm4, -1e+10, %v678_v42  ;;  %v1438_v44 = vpop.f32.mrb[5].mxu0 }
 0x1d8   : > { %v681_v45 = vpop.f32.mrb[6].mxu0  ;;  %v686_v46 = vsel %vm685_vm5, %v684_v43, -inf }
 0x1d9   : > { %687 = vmax.xlane.f32.xlu0 %v686_v46  ;;  %v1439_v47 = vpop.f32.mrb[7].mxu0 }
 0x248   : > { %v792_v48 = vpop.f32.mrb[8].mxu0 }
 0x249   : > { %v798_v49 = vsel %vm636_vm4, -1e+10, %v792_v48  ;;  %v1450_v50 = vpop.f32.mrb[9].mxu0 }
 0x24a   : > { %v795_v51 = vpop.f32.mrb[10].mxu0  ;;  %v799_v52 = vsel %vm685_vm5, %v798_v49, -inf }
 0x24b   : > { %800 = vmax.xlane.f32.xlu1 %v799_v52  ;;  %v1451_v53 = vpop.f32.mrb[11].mxu0  ;;  %v1563_v52 = vld [vmem:[%s2015_s7] sm:$0xff]  }
 0x24c   : > { %1483 = vmatpush3.bf16.msra.mxu0 %v1563_v52  ;;  %v1564_v53 = vld [vmem:[%s2015_s7 + $0x8] sm:$0xff]  }
 0x24d   : > { %1484 = vmatprep.subr.bf16.mxu0 %v1663_v1 }
 0x250   : > { %v909_v54 = vpop.f32.mrb[12].mxu0  ;;  %1485 = vmatpush3.bf16.msra.mxu0 %v1564_v53 }
 0x251   : > { %v915_v55 = vsel %vm636_vm4, -1e+10, %v909_v54  ;;  %v1462_v56 = vpop.f32.mrb[13].mxu0 }
 0x252   : > { %v912_v57 = vpop.f32.mrb[14].mxu0  ;;  %v916_v58 = vsel %vm685_vm5, %v915_v55, -inf }
 0x253   : > { %917 = vmax.xlane.f32.xlu0 %v916_v58  ;;  %v1463_v59 = vpop.f32.mrb[15].mxu0 }
 0x258   : > { %v1026_v60 = vpop.f32.mrb[16].mxu0 }
 0x259   : > { %v1032_v61 = vsel %vm636_vm4, -1e+10, %v1026_v60  ;;  %v1474_v62 = vpop.f32.mrb[17].mxu0 }
 0x25a   : > { %v1029_v63 = vpop.f32.mrb[18].mxu0  ;;  %v1033_v0 = vsel %vm685_vm5, %v1032_v61, -inf }
 0x25b   : > { %1034 = vmax.xlane.f32.xlu0 %v1033_v0  ;;  %v1475_v2 = vpop.f32.mrb[19].mxu0 }
 0x266   : > { %v688_v3 = vpop.xlane.xlu0 %687 }
 0x267   : > { %v689_v4 = vsub.f32 %v684_v43, %v688_v3  ;;  %v1380_v3 = vld [vmem:[%s2016_s8] ss:$0 sm:$0xff] }
 0x269   : > { %v690_v5 = vmul.f32 1.442695, %v689_v4 }
 0x26b   : > { %1565 = vpow2.f32 %v690_v5 }
 0x275   : > { %v1566_v6 = vpop.eup %1565 }
 0x276   : > { %v692_v8 = vsel %vm685_vm5, %v1566_v6, 0.0 }
 0x277   : > { %693 = vadd.xlane.f32.xlu1 %v692_v8 }
 0x288   : > { %700 = vrot.lane.b32.xlu1 %v1850_v23, %s1669_s29  ;;  %s1949_s29 = scalar_lea.sflag [#allocation4], %s462_s17 }
 0x2d8   : > { %v801_v9 = vpop.xlane.xlu1 %800 }
 0x2d9   : > { %v802_v10 = vsub.f32 %v798_v49, %v801_v9 }
 0x2db   : > { %v803_v11 = vmul.f32 1.442695, %v802_v10 }
 0x2dd   : > { %1567 = vpow2.f32 %v803_v11 }
 0x2e0   : > { %v918_v12 = vpop.xlane.xlu0 %917 }
 0x2e1   : > { %v919_v13 = vsub.f32 %v915_v55, %v918_v12 }
 0x2e3   : > { %v920_v14 = vmul.f32 1.442695, %v919_v13 }
 0x2e5   : > { %1569 = vpow2.f32 %v920_v14 }
 0x2e7   : > { %v1568_v15 = vpop.eup %1567 }
 0x2e8   : > { %v1035_v16 = vpop.xlane.xlu0 %1034  ;;  %v805_v17 = vsel %vm685_vm5, %v1568_v15, 0.0 }
 0x2e9   : > { %v1036_v18 = vsub.f32 %v1032_v61, %v1035_v16  ;;  %806 = vadd.xlane.f32.xlu0 %v805_v17 }
 0x2eb   : > { %v1037_v19 = vmul.f32 1.442695, %v1036_v18 }
 0x2ed   : > { %1571 = vpow2.f32 %v1037_v19 }
 0x2ef   : > { %v1570_v20 = vpop.eup %1569 }
 0x2f0   : > { %v922_v21 = vsel %vm685_vm5, %v1570_v20, 0.0 }
 0x2f1   : > { %923 = vadd.xlane.f32.xlu1 %v922_v21 }
 0x2f7   : > { %v1572_v22 = vpop.eup %1571 }
 0x2f8   : > { %v1039_v24 = vsel %vm685_vm5, %v1572_v22, 0.0 }
 0x2f9   : > { %1040 = vadd.xlane.f32.xlu0 %v1039_v24 }
 0x302   : > { %930 = vrot.lane.b32.xlu1 %v1850_v23, %s1670_s25  ;;  %s1392_s25 = sshll.u32 %s1653_s24, 9  ;;  %s1676_s24 = smov [#allocation3]  }
 0x303   : > { %s1943_s5 = scalar_lea.hbm %s2020_s12, %s1392_s25 }
 0x304   : > { %v694_v25 = vpop.xlane.xlu1 %693 }
 0x305   : > { %1573 = vrcp.f32 %v694_v25 }
 0x306   : > { %1047 = vrot.lane.b32.xlu1 %v1850_v23, %s1671_s14  ;;  %s1224_s14 = sshll.u32 %s1900_s27, 4  ;;  %s1945_s14 = int_to_ptr.vmem [resolvable:$true] %s1224_s14 }
 0x307   : > { %s1583_s19 = scalar_lea.vmem %s1945_s14, 512 }
 0x308   : > { %v701_v26 = vpop.permute.xlu1 %700  ;;  %p1584_p12 = scmp.ne.s32.totalorder %s1945_s14, %s1583_s19 }
 0x309   : > { %1441 = vmatpush3.bf16.msra.mxu1 %v701_v26 }
 0x30a   : > { %1452 = vmatprep.subr.bf16.mxu1 %v1663_v1  ;;  %p1585_p13 = pnand %p1584_p12, %p1783_p4 }
 0x30c   : > { %p1586_p0 = pneg %p1585_p13 }
 0x30f   : > { %v1574_v27 = vpop.eup %1573  ;;  %813 = vrot.lane.b32.xlu0 %v1850_v23, %s1672_s20  ;;  %s1675_s20 = smov 24  }
 0x310   : > { %v696_v28 = vmul.f32 %v1574_v27, %v1566_v6 }
 0x312   : > { %697 = vst.msk [vmem:[%s1900_s27] sm:$0xff] %vm685_vm5, %v696_v28  ;;  %v698_v29 = vpack.c.bf16 %v696_v28, %v696_v28 }
 0x314   : > { %1443 = vmatmul.mubr.msk.bf16.vlgmr.msra.gmra.mrb[4].mxu1 %vm685_vm5, %v698_v29 }
 0x315   : > { %1454 = vmatprep.mubr.msk.bf16.mxu1 %vm1664_vm0, %v1663_v1 }
 0x376   : > { %v807_v30 = vpop.xlane.xlu0 %806 }
 0x377   : > { %1575 = vrcp.f32 %v807_v30 }
 0x37e   : > { %v924_v31 = vpop.xlane.xlu1 %923 }
 0x37f   : > { %1577 = vrcp.f32 %v924_v31 }
 0x381   : > { %v1576_v32 = vpop.eup %1575 }
 0x382   : > { %v809_v23 = vmul.f32 %v1576_v32, %v1568_v15  ;;  %v931_v38 = vpop.permute.xlu1 %930 }
 0x384   : > { %1372 = vst.msk [vmem:[%s1900_s27 + $0x8] sm:$0xff] %vm685_vm5, %v809_v23  ;;  %v812_v37 = vpack.c.bf16 %v809_v23, %v809_v23 }
 0x386   : > { %v1041_v33 = vpop.xlane.xlu0 %1040  ;;  %v1048_v42 = vpop.permute.xlu1 %1047 }
 0x387   : > { %1579 = vrcp.f32 %v1041_v33 }
 0x389   : > { %v1578_v34 = vpop.eup %1577 }
 0x38a   : > { %v926_v35 = vmul.f32 %v1578_v34, %v1570_v20  ;;  %v814_v36 = vpop.permute.xlu0 %813 }
 0x38b   : > { %1453 = vmatpush3.bf16.msra.mxu1 %v814_v36 }
 0x38c   : > { %1375 = vst.msk [vmem:[%s1900_s27 + $0x10] sm:$0xff] %vm685_vm5, %v926_v35  ;;  %1464 = vmatprep.subr.bf16.mxu1 %v1663_v1  ;;  %v929_v41 = vpack.c.bf16 %v926_v35, %v926_v35 }
 0x38e   : > { %1455 = vmatmul.mubr.msk.bf16.vlgmr.msra.gmra.mrb[8].mxu1 %vm685_vm5, %v812_v37 }
 0x38f   : > { %1465 = vmatpush3.bf16.msra.mxu1 %v931_v38  ;;  %1466 = vmatprep.mubr.msk.bf16.mxu1 %vm1664_vm0, %v1663_v1 }
 0x390   : > { %1476 = vmatprep.subr.bf16.mxu1 %v1663_v1 }
 0x391   : > { %v1580_v39 = vpop.eup %1579 }
 0x392   : > { %v1043_v40 = vmul.f32 %v1580_v39, %v1572_v22 }
 0x394   : > { %1378 = vst.msk [vmem:[%s1900_s27 + $0x18] sm:$0xff] %vm685_vm5, %v1043_v40  ;;  %v1046_v43 = vpack.c.bf16 %v1043_v40, %v1043_v40  ;;  %s1587_s27 = sshll.u32 %s1676_s24, 4  ;;  %s1588_s27 = int_to_ptr.vmem [resolvable:$false] %s1587_s27 }
 0x395   : > { %p1590_p1 = scmp.lt.s32.totalorder %s1945_s14, %s1588_s27 }
 0x396   : > { %1467 = vmatmul.mubr.msk.bf16.vlgmr.msra.gmra.mrb[12].mxu1 %vm685_vm5, %v929_v41 }
 0x397   : > { %1477 = vmatpush3.bf16.msra.mxu1 %v1048_v42  ;;  %1478 = vmatprep.mubr.msk.bf16.mxu1 %vm1664_vm0, %v1663_v1 }
 0x39e   : > { %1479 = vmatmul.mubr.msk.bf16.vlgmr.msra.gmra.mrb[16].mxu1 %vm685_vm5, %v1046_v43 }
 0x3e7   : > { %v740_v44 = vpop.f32.mrb[4].mxu1 }
 0x3e8   : > { %746 = vst.msk [vmem:[#allocation2] sm:$0xff] %vm637_vm2, %v740_v44  ;;  %v1444_v45 = vpop.f32.mrb[5].mxu1 }
 0x3e9   : > { %v743_v46 = vpop.f32.mrb[6].mxu1 }
 0x3ea   : > { %v1445_v47 = vpop.f32.mrb[7].mxu1 }
 0x461   : > { %v853_v48 = vpop.f32.mrb[8].mxu1 }
 0x462   : > { %860 = vrot.lane.b32.xlu0 %v853_v48, %s2024_s28  ;;  %v1456_v49 = vpop.f32.mrb[9].mxu1  ;;  %s1589_s28 = scalar_lea.vmem %s1588_s27, 1024 }
 0x463   : > { %v856_v50 = vpop.f32.mrb[10].mxu1  ;;  %p1591_p2 = scmp.lt.s32.totalorder %s1589_s28, %s1583_s19 }
 0x464   : > { %v1457_v51 = vpop.f32.mrb[11].mxu1 }
 0x465   : > { %p1592_p3 = por %p1591_p2, %p1590_p1 }
 0x467   : > { %p1593_p5 = pnand %p1592_p3, %p1586_p0 }
 0x469   : > { %v970_v54 = vpop.f32.mrb[12].mxu1 }
 0x46a   : > { %977 = vrot.lane.b32.xlu1 %v970_v54, %s1674_s18  ;;  %v1468_v55 = vpop.f32.mrb[13].mxu1 }
 0x46b   : > { %v973_v56 = vpop.f32.mrb[14].mxu1 }
 0x46c   : > { %v1469_v57 = vpop.f32.mrb[15].mxu1 }
 0x471   : > { %v1087_v58 = vpop.f32.mrb[16].mxu1 }
 0x472   : > { %1094 = vrot.lane.b32.xlu0 %v1087_v58, %s1675_s20  ;;  %v1480_v59 = vpop.f32.mrb[17].mxu1 }
 0x473   : > { %v1090_v60 = vpop.f32.mrb[18].mxu1 }
 0x474   : > { %v1481_v61 = vpop.f32.mrb[19].mxu1 }
 0x4d4   : > { %v861_v62 = vpop.permute.xlu0 %860 }
 0x4d5   : > { %864 = vst.msk [vmem:[#allocation2] sm:$0xff] %vm863_vm6, %v861_v62 }
 0x4dc   : > { %v978_v63 = vpop.permute.xlu1 %977 }
 0x4dd   : > { %981 = vst.msk [vmem:[#allocation2] sm:$0xff] %vm980_vm7, %v978_v63 }
 0x4e4   : > { %v1095_v1 = vpop.permute.xlu0 %1094 }
 0x4e5   : > { %1098 = vst.msk [vmem:[#allocation2] sm:$0xff] %vm1097_vm8, %v1095_v1 }
 0x4ec   : > { %v1099_v0 = vld [vmem:[#allocation2] sm:$0xff] }
 0x4ed   : > { %v1100_v2 = vpack.c.bf16 %v1099_v0, %v1099_v0 }
 0x4ef   : > { %1487 = vmatmul.mubr.msk.bf16.vlgmr.msra.gmra.mrb[20].mxu0 %vm513_vm1, %v1100_v2 }
 0x5c2   : > { %v1161_v4 = vpop.f32.mrb[20].mxu0 }
 0x5c3   : > { %v1162_v5 = vadd.f32 %v1380_v3, %v1161_v4  ;;  %v1488_v6 = vpop.f32.mrb[21].mxu0 }
 0x5c4   : > { %v1164_v8 = vpop.f32.mrb[22].mxu0 }
 0x5c5   : > { %v1489_v9 = vpop.f32.mrb[23].mxu0  ;;  %v1167_v10 = vadd.f32 %v1162_v5, %v1833_v7 }
 0x5c7   : > { %v1168_v11 = vsel %vm513_vm1, %v1167_v10, 0.0 }
 0x5c8   : > { %1169 = vadd.xlane.f32.xlu1 %v1168_v11 }
 0x655   : > { %v1170_v12 = vpop.xlane.xlu1 %1169 }
 0x656   : > { %v1172_v13 = vmul.f32 0.03125, %v1170_v12 }
 0x658   : > { %v1173_v14 = vsub.f32 %v1167_v10, %v1172_v13 }
 0x65a   : > { %v1174_v15 = vmul.f32 %v1173_v14, %v1173_v14 }
 0x65c   : > { %v1175_v16 = vsel %vm513_vm1, %v1174_v15, 0.0 }
 0x65d   : > { %1176 = vadd.xlane.f32.xlu0 %v1175_v16 }
 0x65e   : > { %1596 = shalt.err (!%p1593_p5)
}
 0x65f   : > { %s1597_s17 = scalar_lea.hbm %s1943_s5, 512  ;;  %s1601_s20 = scalar_lea.hbm %s2020_s12, 1024 }
 0x660   : > { %p1598_p6 = scmp.ne.s32.totalorder %s1943_s5, %s1597_s17  ;;  %p1602_p10 = scmp.lt.u32.totalorder %s1943_s5, %s2020_s12 }
 0x661   : > { %p1603_p11 = scmp.lt.u32.totalorder %s1601_s20, %s1597_s17  ;;  %p1605_p13 = scmp.lt.u32.totalorder %s1597_s17, %s1943_s5 }
 0x662   : > { %p1599_p7 = pnand %p1598_p6, %p1783_p4 }
 0x663   : > { %p1604_p12 = por %p1603_p11, %p1602_p10 }
 0x664   : > { %p1600_p9 = pneg %p1599_p7 }
 0x665   : > { %p1606_p0 = por %p1605_p13, %p1604_p12 }
 0x667   : > { %p1607_p1 = pnand %p1606_p0, %p1600_p9 }
 0x669   : > { %1610 = shalt.err (!%p1607_p1)
}
 0x66a   : > { %s1677_s19 = smov 128   ;;  %s2031_s28 = smov 8   ;;  %v1384_v20 = vld [vmem:[%s2017_s9] ss:$0 sm:$0xff] }
 0x66b   : > { %1490 = dma.vmem_to_hbm [thread:$0]  (%p1783_p4), %s1945_s14, 512, %s1943_s5, %s1949_s29, %s1677_s19, %s1677_s19, %s2031_s28  }
 0x66c   : > { %v1385_v22 = vld [vmem:[%s2018_s10] ss:$0 sm:$0xff]  ;;  %s2032_s13 = sshll.u32 %s1816_s30, 3 }
 0x66d   : > { %s486_s14 = scalar_lea.vmem %s2019_s11, %s2032_s13 }
 0x6ea   : > { %v1177_v7 = vpop.xlane.xlu0 %1176 }
 0x6eb   : > { %v1178_v17 = vmul.f32 0.03125, %v1177_v7 }
 0x6ed   : > { %v1179_v18 = vadd.f32 1e-05, %v1178_v17 }
 0x6ef   : > { %1581 = vrsqrt.f32 %v1179_v18 }
 0x6f9   : > { %v1582_v19 = vpop.eup %1581 }
 0x6fa   : > { %v1181_v21 = vmul.f32 %v1582_v19, %v1173_v14 }
 0x6fc   : > { %v1189_v24 = vmul.f32 %v1384_v20, %v1181_v21 }
 0x6fe   : > { %v1197_v25 = vadd.f32 %v1385_v22, %v1189_v24 }
 0x700   : > { %1198 = vst.msk [vmem:[%s486_s14] sm:$0xff] %vm513_vm1, %v1197_v25 }
 0x701 PF: > { %p1496_p4 = scmp.ge.s32.totalorder %s1661_s26, 2  ;;  %s1249_s5 = sand.u32 1, %s1641_s21  }
 0x702   : > { %s1250_s29 = scalar_lea.sflag [#allocation4], %s1249_s5 }
 0x703   : > { %p1493_p2 = pnand %p1496_p4, %p1790_p8 }
 0x705   : > { %1636 = dma.done.wait (!%p1493_p2), %s1250_s29, 512  }
 0x706   : > { %1638 = vsyncadd (!%p1493_p2), %s1250_s29, 4294966784  ;;  %s26_s26 = sadd.s32 1, %s1661_s26   ;;  %s2033_s24 = sld [smem:[#allocation6_spill]] }
 0x707   : > { %p23_p3 = scmp.ge.s32.totalorder %s26_s26, 4   ;;  %s2034_s25 = sld [smem:[#allocation7_spill]] }
 0x708   : > { %s2035_s21 = smov %s1645_s22  ;;  %s2036_s22 = smov %s1649_s23 }
 0x709   : > { %s2037_s23 = smov %s1796_s16  ;;  %25 = sbr.rel (!%p23_p3) target bundleno = 6 (0x6), region = 120 }
 0x710   :  { %1255 = vsyncpa [#allocation4], 1 }
 0x711   :  { %1257 = vsyncpa [#allocation4 + $0x1], 1 }

// kernel: decoder_layer_forward.3
= control target key start
LH: loop header
LB: loop body
LE: loop exit
PB: predicated region body
PF: predicated region fallthrough
CT: control target
= control target key end

     0   :  { %s2110_s0 = inlined_call_operand.hbm [shape: f32[2,8,32], index: 0, kind: input, shape index: {}, may-alias: {0,1}]   ;;  %s2111_s1 = inlined_call_operand.hbm [shape: f32[2,8,32], index: 1, kind: input, shape index: {}, may-alias: {0,1}]   ;;  %s2112_s2 = inlined_call_operand.hbm [shape: f32[2,8,8], index: 2, kind: input, shape index: {}]   ;;  %s2113_s3 = inlined_call_operand.vmem [shape: bf16[32,32], index: 3, kind: input, shape index: {}]   ;;  %s2114_s4 = inlined_call_operand.vmem [shape: f32[1,32], index: 4, kind: input, shape index: {}]   ;;  %s2115_s5 = inlined_call_operand.vmem [shape: bf16[32,64], index: 5, kind: input, shape index: {}]   ;;  %s2116_s6 = inlined_call_operand.vmem [shape: f32[1,64], index: 6, kind: input, shape index: {}]   ;;  %s2117_s7 = inlined_call_operand.vmem [shape: bf16[32,32], index: 7, kind: input, shape index: {}]   ;;  %s2118_s8 = inlined_call_operand.vmem [shape: f32[1,32], index: 8, kind: input, shape index: {}]   ;;  %s2119_s9 = inlined_call_operand.vmem [shape: f32[1,32], index: 9, kind: input, shape index: {}]   ;;  %s2120_s10 = inlined_call_operand.vmem [shape: f32[1,32], index: 10, kind: input, shape index: {}]   ;;  %s2121_s11 = inlined_call_operand.vmem [shape: f32[2,8,32], index: 11, kind: output, shape index: {}]  }
   0x1   :  { %2130 = sst [smem:[#allocation14_spill]] %s2111_s1 }
   0x2   :  { %2131 = sst [smem:[#allocation15_spill]] %s2120_s10 }
   0x3   :  { %2132 = sst [smem:[#allocation16_spill]] %s2121_s11 }
   0x4   :  { %16 = vsyncpa [#allocation4], 0 }
   0x5   :  { %18 = vsyncpa [#allocation4 + $0x1], 0 }
   0x6   :  { %19 = vsyncpa [#allocation6], 0 }
   0x7   :  { %21 = vsyncpa [#allocation6 + $0x1], 0  ;;  %s1790_s17 = smov 0   ;;  %s1792_s18 = smov 0  }
   0x8   :  { %s1794_s19 = smov 0   ;;  %s1796_s20 = smov 0  }
   0x9   :  { %s1798_s21 = smov 0   ;;  %s1800_s22 = smov 0  }
   0xa LB: > { %2133 = sst [smem:[#allocation10_spill]] %s1701_s19  ;;  %s2122_s23 = sadd.s32 4294967295, %s1713_s22   ;;  %s1713_s22 = sphi %s1800_s22, %s27_s22   ;;  %s1709_s21 = sphi %s1798_s21, %s2154_s21   ;;  %s1705_s20 = sphi %s1796_s20, %s2153_s20   ;;  %s1701_s19 = sphi %s1794_s19, %s2152_s19   ;;  %s1697_s18 = sphi %s1792_s18, %s2156_s18   ;;  %s1693_s17 = sphi %s1790_s17, %s2155_s17  }
   0xb   : > { %2134 = sst [smem:[#allocation11_spill]] %s1709_s21  ;;  %s39_s24 = sadd.s32 1, %s1709_s21 }
   0xc   : > { %p41_p0 = scmp.ge.s32.totalorder %s39_s24, 2  ;;  %s48_s25 = sadd.s32 1, %s1701_s19 }
   0xd   : > { %p55_p1 = scmp.ne.s32.totalorder %s1701_s19, %s1697_s18  ;;  %p56_p2 = scmp.eq.s32.totalorder %s1713_s22, 0 }
   0xe   : > { %s2158_s24 = smov (%p41_p0, %s39_s24), 0  ;;  %p61_p4 = scmp.ne.s32.totalorder %s1697_s18, %s1693_s17 }
   0xf   : > { %2135 = sst [smem:[#allocation12_spill]] %s2158_s24  ;;  %p57_p3 = por %p56_p2, %p55_p1 }
  0x10   : > { %s43_s26 = ssub.s32 %s1709_s21, %s2158_s24  ;;  %p62_p5 = scmp.eq.s32.totalorder %s2122_s23, 0 }
  0x11   : > { %p46_p6 = scmp.eq.s32.totalorder %s43_s26, 0  ;;  %p1484_p8 = scmp.lt.s32.totalorder %s1713_s22, 2 }
  0x12   : > { %p1831_p7 = por %p62_p5, %p61_p4  ;;  %s2123_s29 = sand.u32 1, %s1701_s19  }
  0x13   : > { %s1837_s28 = scalar_select %p46_p6, %s1701_s19, %s48_s25  }
  0x14   : > { %s2136_s27 = scalar_select %p1831_p7, 1, 0 }
  0x15   : > { %2137 = sst [smem:[#allocation13_spill]] %s1837_s28  ;;  %s1841_s30 = sshll.u32 %s1709_s21, 7 }
  0x16   : > { %s1845_s12 = sshll.u32 %s2123_s29, 3  ;;  %p1847_p9 = pnand %p1484_p8, %p57_p3 }
  0x17   : > { %s378_s14 = sand.u32 1, %s1713_s22   ;;  %s2139_s1 = sld [smem:[#allocation14_spill]] }
  0x18   : > { %s2138_s13 = scalar_select %p1847_p9, 1, 0 }
  0x19   : > { %s382_s25 = scalar_lea.vmem [#allocation5], %s1845_s12  ;;  %s1862_s23 = scalar_lea.sflag [#allocation6], %s378_s14 }
  0x1a   : > { %s389_s26 = sshll.u32 %s382_s25, 4  ;;  %p1868_p12 = pneg %p1847_p9  ;;  %s1859_s26 = int_to_ptr.vmem [resolvable:$true] %s389_s26 }
  0x1d   : > { %s1856_s17 = scalar_lea.hbm %s2139_s1, %s1841_s30  ;;  %s1574_s25 = scalar_lea.hbm %s2139_s1, 256 }
  0x1e   : > { %s1569_s29 = scalar_lea.hbm %s1856_s17, 128  ;;  %p1575_p1 = scmp.lt.u32.totalorder %s1856_s17, %s2139_s1 }
  0x1f   : > { %p1570_p11 = scmp.ne.s32.totalorder %s1856_s17, %s1569_s29  ;;  %p1576_p2 = scmp.lt.u32.totalorder %s1574_s25, %s1569_s29 }
  0x20   : > { %p1578_p4 = scmp.lt.u32.totalorder %s1569_s29, %s1856_s17 }
  0x21   : > { %p1572_p13 = pnand %p1868_p12, %p1570_p11  ;;  %p1577_p3 = por %p1576_p2, %p1575_p1 }
  0x23   : > { %p1573_p0 = pneg %p1572_p13  ;;  %p1579_p5 = por %p1578_p4, %p1577_p3 }
  0x25   : > { %p1580_p6 = pnand %p1579_p5, %p1573_p0 }
  0x27   : > { %1583 = shalt.err (!%p1580_p6)
}
  0x28   : > { %s1584_s14 = scalar_lea.vmem %s1859_s26, 128  ;;  %s1715_s15 = smov [#allocation5]  }
  0x29   : > { %p1585_p8 = scmp.ne.s32.totalorder %s1859_s26, %s1584_s14  ;;  %s1589_s16 = sshll.u32 %s1715_s15, 4  ;;  %s1590_s16 = int_to_ptr.vmem [resolvable:$false] %s1589_s16 }
  0x2a   : > { %s1591_s21 = scalar_lea.vmem %s1590_s16, 256  ;;  %p1592_p10 = scmp.lt.s32.totalorder %s1859_s26, %s1590_s16 }
  0x2b   : > { %p1587_p11 = pnand %p1585_p8, %p1868_p12  ;;  %p1593_p7 = scmp.lt.s32.totalorder %s1591_s21, %s1584_s14 }
  0x2d   : > { %p1588_p13 = pneg %p1587_p11  ;;  %p1594_p1 = por %p1593_p7, %p1592_p10 }
  0x2f   : > { %p1595_p2 = pnand %p1594_p1, %p1588_p13 }
  0x31   : > { %1598 = shalt.err (!%p1595_p2)
}
  0x32   : > { %1480 = dma.hbm_to_vmem [thread:$0]  (!%p1847_p9), %s1856_s17, 128, %s1859_s26, %s1862_s23  }
  0x33   : > { %p413_p0 = scmp.lt.s32.totalorder %s1713_s22, 3  ;;  %p2141_p3 = scmp.ge.s32.totalorder %s1713_s22, 1 }
  0x34   : > { %s1903_s14 = scalar_lea.hbm %s2110_s0, %s1841_s30  ;;  %s363_s15 = scalar_lea.vmem [#allocation3], %s1845_s12 }
  0x35   : > { %p1895_p4 = pnand %p2141_p3, %p413_p0  ;;  %s371_s16 = sshll.u32 %s363_s15, 4  ;;  %s372_s16 = int_to_ptr.vmem [resolvable:$true] %s371_s16 }
  0x36   : > { %s2143_s21 = sand.u32 1, %s1701_s19   ;;  %s1599_s26 = scalar_lea.hbm %s1903_s14, 128 }
  0x37   : > { %s2142_s28 = scalar_select %p1895_p4, 1, 0 }
  0x38   : > { %s360_s17 = scalar_lea.sflag [#allocation4], %s2143_s21  ;;  %p1600_p7 = scmp.ne.s32.totalorder %s1903_s14, %s1599_s26 }
  0x39   : > { %s1604_s29 = scalar_lea.hbm %s2110_s0, 256  ;;  %p1605_p6 = scmp.lt.u32.totalorder %s1903_s14, %s2110_s0 }
  0x3a   : > { %p1602_p10 = pnand %p1600_p7, %p1868_p12  ;;  %p1606_p8 = scmp.lt.u32.totalorder %s1604_s29, %s1599_s26 }
  0x3b   : > { %p1608_p13 = scmp.lt.u32.totalorder %s1599_s26, %s1903_s14 }
  0x3c   : > { %p1603_p5 = pneg %p1602_p10  ;;  %p1607_p11 = por %p1606_p8, %p1605_p6 }
  0x3e   : > { %p1609_p1 = por %p1608_p13, %p1607_p11 }
  0x40   : > { %p1610_p2 = pnand %p1609_p1, %p1603_p5 }
  0x42   : > { %1613 = shalt.err (!%p1610_p2)
}
  0x43   : > { %s1614_s15 = scalar_lea.vmem %s372_s16, 128  ;;  %s1716_s21 = smov [#allocation3]  }
  0x44   : > { %p1615_p0 = scmp.ne.s32.totalorder %s372_s16, %s1614_s15  ;;  %s1619_s19 = sshll.u32 %s1716_s21, 4  ;;  %s1620_s19 = int_to_ptr.vmem [resolvable:$false] %s1619_s19 }
  0x45   : > { %s1621_s1 = scalar_lea.vmem %s1620_s19, 256  ;;  %p1622_p10 = scmp.lt.s32.totalorder %s372_s16, %s1620_s19 }
  0x46   : > { %p1617_p3 = pnand %p1615_p0, %p1868_p12  ;;  %p1623_p4 = scmp.lt.s32.totalorder %s1621_s1, %s1614_s15 }
  0x48   : > { %p1618_p7 = pneg %p1617_p3  ;;  %p1624_p9 = por %p1623_p4, %p1622_p10 }
  0x4a   : > { %p1625_p6 = pnand %p1624_p9, %p1618_p7 }
  0x4c   : > { %1628 = shalt.err (!%p1625_p6)
}
  0x4d   : > { %p2144_p8 = scmp.ne.s32.totalorder %s2138_s13, 0  ;;  %s1929_s26 = scalar_lea.hbm %s2112_s2, %s1841_s30 }
  0x4e   : > { %s400_s19 = scalar_lea.vmem [#allocation7], %s1845_s12  ;;  %s1629_s25 = scalar_lea.hbm %s1929_s26, 128 }
  0x4f   : > { %1477 = dma.hbm_to_vmem [thread:$0]  (!%p2144_p8), %s1903_s14, 128, %s372_s16, %s360_s17  }
  0x50   : > { %s408_s29 = sshll.u32 %s400_s19, 4  ;;  %p1630_p9 = scmp.ne.s32.totalorder %s1929_s26, %s1629_s25  ;;  %s409_s29 = int_to_ptr.vmem [resolvable:$true] %s408_s29 }
  0x51   : > { %s1634_s14 = scalar_lea.hbm %s2112_s2, 256  ;;  %p1635_p11 = scmp.lt.u32.totalorder %s1929_s26, %s2112_s2 }
  0x52   : > { %p1632_p4 = pnand %p1630_p9, %p1868_p12  ;;  %p1636_p13 = scmp.lt.u32.totalorder %s1634_s14, %s1629_s25 }
  0x53   : > { %p1638_p2 = scmp.lt.u32.totalorder %s1629_s25, %s1929_s26 }
  0x54   : > { %p1633_p5 = pneg %p1632_p4  ;;  %p1637_p1 = por %p1636_p13, %p1635_p11 }
  0x56   : > { %p1639_p0 = por %p1638_p2, %p1637_p1 }
  0x58   : > { %p1640_p3 = pnand %p1639_p0, %p1633_p5 }
  0x5a   : > { %1643 = shalt.err (!%p1640_p3)
}
  0x5b   : > { %s1644_s30 = scalar_lea.vmem %s409_s29, 128  ;;  %s1717_s12 = smov [#allocation7]  }
  0x5c   : > { %p1645_p7 = scmp.ne.s32.totalorder %s409_s29, %s1644_s30  ;;  %s1649_s1 = sshll.u32 %s1717_s12, 4  ;;  %s1650_s1 = int_to_ptr.vmem [resolvable:$false] %s1649_s1 }
  0x5d   : > { %s1651_s10 = scalar_lea.vmem %s1650_s1, 256  ;;  %p1652_p9 = scmp.lt.s32.totalorder %s409_s29, %s1650_s1 }
  0x5e   : > { %p1647_p10 = pnand %p1645_p7, %p1868_p12  ;;  %p1653_p4 = scmp.lt.s32.totalorder %s1651_s10, %s1644_s30 }
  0x60   : > { %p1648_p6 = pneg %p1647_p10  ;;  %p1654_p8 = por %p1653_p4, %p1652_p9 }
  0x62   : > { %p1655_p11 = pnand %p1654_p8, %p1648_p6 }
  0x64   : > { %1658 = shalt.err (!%p1655_p11)
}
  0x65   : > { %p2145_p13 = scmp.ne.s32.totalorder %s2138_s13, 0  ;;  %p2146_p5 = scmp.ne.s32.totalorder %s2142_s28, 0 }
  0x66   : > { %s419_s24 = sand.u32 (!%p2146_p5), 1, %s1697_s18   ;;  %p2147_p12 = scmp.ne.s32.totalorder (!%p2146_p5), %s2136_s27, 0 }
  0x67   : > { %1483 = dma.hbm_to_vmem [thread:$0]  (!%p2145_p13), %s1929_s26, 128, %s409_s29, %s1862_s23  }
  0x68   : > { %417 = sbr.rel (%p2146_p5) target bundleno = 1886 (0x75e), region = 64  ;;  %s1953_s11 = sshll.u32 (!%p2146_p5), %s419_s24, 3 }
  0x69   : > { %s420_s19 = scalar_lea.sflag (!%p2146_p5), [#allocation4], %s419_s24  ;;  %s423_s25 = scalar_lea.vmem (!%p2146_p5), [#allocation3], %s1953_s11 }
  0x6f   : > { %1684 = dma.done.wait (%p2147_p12), %s420_s19, 128  }
  0x70   : > { %1686 = vsyncadd (%p2147_p12), %s420_s19, 4294967168  ;;  %s2148_s13 = sadd.s32 4294967295, %s1713_s22   ;;  %s432_s26 = scalar_lea.vmem [#allocation5], %s1953_s11 }
  0x71   : > { %s428_s23 = sand.u32 1, %s2148_s13  }
  0x72   : > { %s429_s28 = scalar_lea.sflag [#allocation6], %s428_s23 }
  0x73   : > { %1688 = dma.done.wait (%p2147_p12), %s429_s28, 256  }
  0x74   : > { %1690 = vsyncadd (%p2147_p12), %s429_s28, 4294967040  ;;  %v1718_v0 = vmov 0.0   ;;  %vm1719_vm0 = vmmov 0   ;;  %v1545_v1 = vld [vmem:[%s2115_s5] sm:$0xff]   ;;  %v1547_v3 = vld [vmem:[%s2115_s5 + $0x8] sm:$0xff]   ;;  %vm525_vm1 = vcmask 261120  }
  0x75   : > { %1404 = vmatprep.subr.bf16.mxu1 %v1718_v0  ;;  %1396 = vmatprep.subr.bf16.mxu0 %v1718_v0  ;;  %v1546_v2 = vld [vmem:[%s2113_s3] sm:$0xff]   ;;  %v1548_v5 = vld [vmem:[%s2113_s3 + $0x8] sm:$0xff]   ;;  %vm641_vm2 = vcmask 64512   ;;  %s1720_s19 = smov 112   ;;  %s1722_s13 = smov 104   ;;  %vm707_vm4 = vcmask 1043456  }
  0x76   : > { %1408 = vmatprep.mubr.msk.bf16.mxu1 %vm1719_vm0, %v1718_v0  ;;  %1400 = vmatprep.mubr.msk.bf16.mxu0 %vm1719_vm0, %v1718_v0  ;;  %v569_v4 = vld [vmem:[%s432_s26] sm:$0xff]  ;;  %v1987_v6 = vld [vmem:[%s423_s25] sm:$0xff]  ;;  %s1721_s25 = smov 120   ;;  %s441_s23 = scalar_lea.vmem [#allocation7], %s1953_s11  ;;  %vm868_vm5 = vcmask 130112   ;;  %vm985_vm6 = vcmask 195712  }
  0x77   : > { %1405 = vmatpush3.bf16.msra.mxu1 %v1545_v1  ;;  %1397 = vmatpush3.bf16.msra.mxu0 %v1546_v2  ;;  %v570_v7 = vpack.c.bf16 %v569_v4, %v569_v4  ;;  %v501_v8 = vpack.c.bf16 %v1987_v6, %v1987_v6  ;;  %v1351_v9 = vld [vmem:[%s2116_s6] ss:$0 sm:$0xff]  ;;  %v639_v33 = vld [vmem:[%s441_s23] sm:$0xff]  ;;  %s1723_s11 = smov 96   ;;  %s1724_s28 = smov 80   ;;  %vm1102_vm7 = vcmask 261312  }
  0x78   : > { %1406 = vmatprep.subr.bf16.mxu1 %v1718_v0  ;;  %1398 = vmatprep.subr.bf16.mxu0 %v1718_v0  ;;  %v1347_v10 = vld [vmem:[%s2114_s4] ss:$0 sm:$0xff]  ;;  %vm640_vm3 = vcmp.eq.f32.partialorder %v639_v33, 0.0  ;;  %s1725_s26 = smov 72   ;;  %s1726_s29 = smov 88  }
  0x79   : > { %s1727_s15 = smov 8   ;;  %s1728_s17 = smov 16  }
  0x7a   : > { %s1729_s30 = smov 24   ;;  %p492_p8 = scmp.lt.s32.totalorder %s1705_s20, 1 }
  0x7b   : > { %1407 = vmatpush3.bf16.msra.mxu1 %v1547_v3  ;;  %1399 = vmatpush3.bf16.msra.mxu0 %v1548_v5  ;;  %s2149_s23 = sld [smem:[#allocation15_spill]] }
  0x7c   : > { %1418 = vmatprep.subr.bf16.mxu1 %v1718_v0  ;;  %1412 = vmatprep.subr.bf16.mxu0 %v1718_v0  ;;  %s2160_s20 = smov (!%p492_p8, %s1705_s20), 1 }
  0x7e   : > { %1409 = vmatmul.mubr.msk.bf16.vlgmr.msra.gmra.mrb[0].mxu1 %vm525_vm1, %v570_v7  ;;  %1401 = vmatmul.mubr.msk.bf16.vlgmr.msra.gmra.mrb[0].mxu0 %vm525_vm1, %v501_v8 }
  0x7f   : > { %1420 = vmatprep.mubr.msk.bf16.mxu1 %vm1719_vm0, %v1718_v0  ;;  %1414 = vmatprep.mubr.msk.bf16.mxu0 %vm1719_vm0, %v1718_v0 }
 0x151   : > { %v631_v11 = vpop.f32.mrb[0].mxu1  ;;  %v563_v14 = vpop.f32.mrb[0].mxu0 }
 0x152   : > { %v632_v12 = vadd.f32 %v1351_v9, %v631_v11  ;;  %v1410_v13 = vpop.f32.mrb[1].mxu1  ;;  %v564_v16 = vadd.f32 %v1347_v10, %v563_v14  ;;  %v1402_v17 = vpop.f32.mrb[1].mxu0 }
 0x153   : > { %v634_v15 = vpop.f32.mrb[2].mxu1  ;;  %v566_v20 = vpop.f32.mrb[2].mxu0 }
 0x154   : > { %v2005_v18 = vpack.c.bf16 %v632_v12, %v632_v12  ;;  %v1411_v19 = vpop.f32.mrb[3].mxu1  ;;  %v1403_v21 = vpop.f32.mrb[3].mxu0  ;;  %v637_v22 = vpack.c.bf16 %v564_v16, %v564_v16 }
 0x156   : > { %872 = vrot.lane.b32.xlu1 %v2005_v18, %s1720_s19  ;;  %755 = vrot.lane.b32.xlu0 %v2005_v18, %s1721_s25  ;;  %v646_v23 = vsel %vm641_vm2, %v2005_v18, 0 }
 0x157   : > { %1413 = vmatpush3.bf16.xpose.msra.mxu0 %v646_v23 }
 0x158   : > { %1424 = vmatprep.subr.bf16.mxu0 %v1718_v0 }
 0x15a   : > { %870 = vrot.lane.b32.xlu1 %v637_v22, %s1720_s19  ;;  %753 = vrot.lane.b32.xlu0 %v637_v22, %s1721_s25  ;;  %s1346_s19 = sshll.u32 %s2160_s20, 3 }
 0x15e   : > { %987 = vrot.lane.b32.xlu1 %v637_v22, %s1722_s13  ;;  %989 = vrot.lane.b32.xlu0 %v2005_v18, %s1722_s13 }
 0x15f   : > { %1415 = vmatmul.mubr.msk.bf16.vlgmr.msra.gmra.mrb[4].mxu0 %vm641_vm2, %v637_v22 }
 0x160   : > { %1426 = vmatprep.mubr.msk.bf16.mxu0 %vm1719_vm0, %v1718_v0 }
 0x1c8   : > { %v756_v24 = vpop.permute.xlu0 %755  ;;  %v873_v26 = vpop.permute.xlu1 %872 }
 0x1c9   : > { %v761_v25 = vsel %vm641_vm2, %v756_v24, 0  ;;  %v878_v28 = vsel %vm641_vm2, %v873_v26, 0 }
 0x1ca   : > { %1425 = vmatpush3.bf16.xpose.msra.mxu0 %v761_v25 }
 0x1cb   : > { %1436 = vmatprep.subr.bf16.mxu0 %v1718_v0 }
 0x1cc   : > { %v754_v27 = vpop.permute.xlu0 %753  ;;  %v871_v30 = vpop.permute.xlu1 %870 }
 0x1d0   : > { %v990_v29 = vpop.permute.xlu0 %989  ;;  %v988_v32 = vpop.permute.xlu1 %987 }
 0x1d1   : > { %1427 = vmatmul.mubr.msk.bf16.vlgmr.msra.gmra.mrb[8].mxu0 %vm641_vm2, %v754_v27  ;;  %v995_v31 = vsel %vm641_vm2, %v990_v29, 0 }
 0x1d2   : > { %1437 = vmatpush3.bf16.xpose.msra.mxu0 %v878_v28  ;;  %1438 = vmatprep.mubr.msk.bf16.mxu0 %vm1719_vm0, %v1718_v0 }
 0x1d3   : > { %1448 = vmatprep.subr.bf16.mxu0 %v1718_v0 }
 0x1d9   : > { %1439 = vmatmul.mubr.msk.bf16.vlgmr.msra.gmra.mrb[12].mxu0 %vm641_vm2, %v871_v30 }
 0x1da   : > { %1449 = vmatpush3.bf16.xpose.msra.mxu0 %v995_v31  ;;  %1450 = vmatprep.mubr.msk.bf16.mxu0 %vm1719_vm0, %v1718_v0 }
 0x1db   : > { %1460 = vmatprep.subr.bf16.mxu0 %v1718_v0 }
 0x1e1   : > { %1451 = vmatmul.mubr.msk.bf16.vlgmr.msra.gmra.mrb[16].mxu0 %vm641_vm2, %v988_v32 }
 0x1e2   : > { %1464 = vmatprep.mubr.msk.bf16.mxu0 %vm1719_vm0, %v1718_v0 }
 0x232   : > { %v682_v34 = vpop.f32.mrb[4].mxu0 }
 0x233   : > { %v688_v35 = vsel %vm640_vm3, -1e+10, %v682_v34  ;;  %v1416_v36 = vpop.f32.mrb[5].mxu0 }
 0x234   : > { %v685_v37 = vpop.f32.mrb[6].mxu0  ;;  %v689_v38 = vsel %vm641_vm2, %v688_v35, -inf }
 0x235   : > { %690 = vmax.xlane.f32.xlu0 %v689_v38  ;;  %v1417_v39 = vpop.f32.mrb[7].mxu0 }
 0x2a4   : > { %v797_v40 = vpop.f32.mrb[8].mxu0 }
 0x2a5   : > { %v803_v41 = vsel %vm640_vm3, -1e+10, %v797_v40  ;;  %v1428_v42 = vpop.f32.mrb[9].mxu0 }
 0x2a6   : > { %v800_v43 = vpop.f32.mrb[10].mxu0  ;;  %v804_v44 = vsel %vm641_vm2, %v803_v41, -inf }
 0x2a7   : > { %805 = vmax.xlane.f32.xlu1 %v804_v44  ;;  %v1429_v45 = vpop.f32.mrb[11].mxu0 }
 0x2ac   : > { %v914_v46 = vpop.f32.mrb[12].mxu0 }
 0x2ad   : > { %v920_v47 = vsel %vm640_vm3, -1e+10, %v914_v46  ;;  %v1440_v48 = vpop.f32.mrb[13].mxu0 }
 0x2ae   : > { %v917_v49 = vpop.f32.mrb[14].mxu0  ;;  %v921_v50 = vsel %vm641_vm2, %v920_v47, -inf  ;;  %v1549_v48 = vld [vmem:[%s2117_s7] sm:$0xff]  }
 0x2af   : > { %922 = vmax.xlane.f32.xlu0 %v921_v50  ;;  %v1441_v51 = vpop.f32.mrb[15].mxu0  ;;  %1461 = vmatpush3.bf16.msra.mxu0 %v1549_v48  ;;  %v1550_v49 = vld [vmem:[%s2117_s7 + $0x8] sm:$0xff]  }
 0x2b0   : > { %1462 = vmatprep.subr.bf16.mxu0 %v1718_v0 }
 0x2b3   : > { %1463 = vmatpush3.bf16.msra.mxu0 %v1550_v49 }
 0x2b4   : > { %v1031_v52 = vpop.f32.mrb[16].mxu0 }
 0x2b5   : > { %v1037_v53 = vsel %vm640_vm3, -1e+10, %v1031_v52  ;;  %v1452_v54 = vpop.f32.mrb[17].mxu0 }
 0x2b6   : > { %v1034_v55 = vpop.f32.mrb[18].mxu0  ;;  %v1038_v56 = vsel %vm641_vm2, %v1037_v53, -inf }
 0x2b7   : > { %1039 = vmax.xlane.f32.xlu0 %v1038_v56  ;;  %v1453_v57 = vpop.f32.mrb[19].mxu0 }
 0x2c2   : > { %v691_v58 = vpop.xlane.xlu0 %690 }
 0x2c3   : > { %v692_v59 = vsub.f32 %v688_v35, %v691_v58 }
 0x2c5   : > { %v693_v60 = vmul.f32 1.442695, %v692_v59 }
 0x2c7   : > { %1551 = vpow2.f32 %v693_v60 }
 0x2d1   : > { %v1552_v61 = vpop.eup %1551 }
 0x2d2   : > { %v695_v62 = vsel %vm641_vm2, %v1552_v61, 0.0 }
 0x2d3   : > { %696 = vadd.xlane.f32.xlu1 %v695_v62  ;;  %v1363_v62 = vld [vmem:[%s2118_s8] ss:$0 sm:$0xff] }
 0x2e4   : > { %702 = vrot.lane.b32.xlu1 %v2005_v18, %s1723_s11 }
 0x334   : > { %v806_v63 = vpop.xlane.xlu1 %805 }
 0x335   : > { %v807_v1 = vsub.f32 %v803_v41, %v806_v63 }
 0x337   : > { %v808_v2 = vmul.f32 1.442695, %v807_v1 }
 0x339   : > { %1553 = vpow2.f32 %v808_v2 }
 0x33c   : > { %v923_v3 = vpop.xlane.xlu0 %922 }
 0x33d   : > { %v924_v4 = vsub.f32 %v920_v47, %v923_v3 }
 0x33f   : > { %v925_v5 = vmul.f32 1.442695, %v924_v4 }
 0x341   : > { %1555 = vpow2.f32 %v925_v5 }
 0x343   : > { %v1554_v7 = vpop.eup %1553 }
 0x344   : > { %v1040_v8 = vpop.xlane.xlu0 %1039  ;;  %v810_v9 = vsel %vm641_vm2, %v1554_v7, 0.0 }
 0x345   : > { %v1041_v10 = vsub.f32 %v1037_v53, %v1040_v8  ;;  %811 = vadd.xlane.f32.xlu0 %v810_v9 }
 0x347   : > { %v1042_v11 = vmul.f32 1.442695, %v1041_v10 }
 0x349   : > { %1557 = vpow2.f32 %v1042_v11 }
 0x34b   : > { %v1556_v12 = vpop.eup %1555 }
 0x34c   : > { %v927_v13 = vsel %vm641_vm2, %v1556_v12, 0.0 }
 0x34d   : > { %928 = vadd.xlane.f32.xlu1 %v927_v13 }
 0x353   : > { %v1558_v14 = vpop.eup %1557 }
 0x354   : > { %v1044_v15 = vsel %vm641_vm2, %v1558_v14, 0.0 }
 0x355   : > { %1045 = vadd.xlane.f32.xlu0 %v1044_v15 }
 0x35e   : > { %933 = vrot.lane.b32.xlu1 %v2005_v18, %s1724_s28 }
 0x360   : > { %v697_v16 = vpop.xlane.xlu1 %696 }
 0x361   : > { %1559 = vrcp.f32 %v697_v16 }
 0x362   : > { %1050 = vrot.lane.b32.xlu1 %v2005_v18, %s1725_s26  ;;  %s2150_s26 = sld [smem:[#allocation16_spill]] }
 0x364   : > { %v703_v17 = vpop.permute.xlu1 %702 }
 0x365   : > { %v709_v19 = vsel %vm707_vm4, %v703_v17, 0 }
 0x366   : > { %1419 = vmatpush3.bf16.msra.mxu1 %v709_v19  ;;  %v1368_v19 = vld [vmem:[%s2149_s23] ss:$0 sm:$0xff] }
 0x367   : > { %1430 = vmatprep.subr.bf16.mxu1 %v1718_v0 }
 0x36b   : > { %v1560_v20 = vpop.eup %1559  ;;  %816 = vrot.lane.b32.xlu0 %v2005_v18, %s1726_s29  ;;  %s498_s29 = scalar_lea.vmem %s2150_s26, %s1346_s19 }
 0x36c   : > { %v699_v21 = vmul.f32 %v1560_v20, %v1552_v61 }
 0x36e   : > { %v700_v22 = vpack.c.bf16 %v699_v21, %v699_v21 }
 0x370   : > { %1421 = vmatmul.mubr.msk.bf16.vlgmr.msra.gmra.mrb[4].mxu1 %vm641_vm2, %v700_v22 }
 0x371   : > { %1432 = vmatprep.mubr.msk.bf16.mxu1 %vm1719_vm0, %v1718_v0 }
 0x3d2   : > { %v812_v23 = vpop.xlane.xlu0 %811 }
 0x3d3   : > { %1561 = vrcp.f32 %v812_v23 }
 0x3da   : > { %v929_v24 = vpop.xlane.xlu1 %928 }
 0x3db   : > { %1563 = vrcp.f32 %v929_v24 }
 0x3dd   : > { %v1562_v25 = vpop.eup %1561 }
 0x3de   : > { %v814_v27 = vmul.f32 %v1562_v25, %v1554_v7  ;;  %v934_v30 = vpop.permute.xlu1 %933 }
 0x3df   : > { %v939_v32 = vsel %vm707_vm4, %v934_v30, 0 }
 0x3e0   : > { %v815_v18 = vpack.c.bf16 %v814_v27, %v814_v27 }
 0x3e2   : > { %v1046_v26 = vpop.xlane.xlu0 %1045  ;;  %v1051_v34 = vpop.permute.xlu1 %1050 }
 0x3e3   : > { %1565 = vrcp.f32 %v1046_v26  ;;  %v1056_v37 = vsel %vm707_vm4, %v1051_v34, 0 }
 0x3e5   : > { %v1564_v31 = vpop.eup %1563 }
 0x3e6   : > { %v817_v28 = vpop.permute.xlu0 %816  ;;  %v931_v33 = vmul.f32 %v1564_v31, %v1556_v12 }
 0x3e7   : > { %v822_v29 = vsel %vm707_vm4, %v817_v28, 0 }
 0x3e8   : > { %1431 = vmatpush3.bf16.msra.mxu1 %v822_v29  ;;  %v932_v35 = vpack.c.bf16 %v931_v33, %v931_v33 }
 0x3e9   : > { %1442 = vmatprep.subr.bf16.mxu1 %v1718_v0 }
 0x3eb   : > { %1433 = vmatmul.mubr.msk.bf16.vlgmr.msra.gmra.mrb[8].mxu1 %vm641_vm2, %v815_v18 }
 0x3ec   : > { %1443 = vmatpush3.bf16.msra.mxu1 %v939_v32  ;;  %1444 = vmatprep.mubr.msk.bf16.mxu1 %vm1719_vm0, %v1718_v0 }
 0x3ed   : > { %1454 = vmatprep.subr.bf16.mxu1 %v1718_v0  ;;  %v1566_v36 = vpop.eup %1565 }
 0x3ee   : > { %v1048_v38 = vmul.f32 %v1566_v36, %v1558_v14 }
 0x3f0   : > { %v1049_v39 = vpack.c.bf16 %v1048_v38, %v1048_v38 }
 0x3f3   : > { %1445 = vmatmul.mubr.msk.bf16.vlgmr.msra.gmra.mrb[12].mxu1 %vm641_vm2, %v932_v35 }
 0x3f4   : > { %1455 = vmatpush3.bf16.msra.mxu1 %v1056_v37  ;;  %1456 = vmatprep.mubr.msk.bf16.mxu1 %vm1719_vm0, %v1718_v0 }
 0x3fb   : > { %1457 = vmatmul.mubr.msk.bf16.vlgmr.msra.gmra.mrb[16].mxu1 %vm641_vm2, %v1049_v39 }
 0x443   : > { %v745_v40 = vpop.f32.mrb[4].mxu1 }
 0x444   : > { %751 = vst.msk [vmem:[#allocation2] sm:$0xff] %vm641_vm2, %v745_v40  ;;  %v1422_v41 = vpop.f32.mrb[5].mxu1 }
 0x445   : > { %v748_v42 = vpop.f32.mrb[6].mxu1 }
 0x446   : > { %v1423_v43 = vpop.f32.mrb[7].mxu1 }
 0x4be   : > { %v858_v44 = vpop.f32.mrb[8].mxu1 }
 0x4bf   : > { %865 = vrot.lane.b32.xlu0 %v858_v44, %s1727_s15  ;;  %v1434_v45 = vpop.f32.mrb[9].mxu1 }
 0x4c0   : > { %v861_v46 = vpop.f32.mrb[10].mxu1 }
 0x4c1   : > { %v1435_v47 = vpop.f32.mrb[11].mxu1 }
 0x4c6   : > { %v975_v50 = vpop.f32.mrb[12].mxu1 }
 0x4c7   : > { %982 = vrot.lane.b32.xlu1 %v975_v50, %s1728_s17  ;;  %v1446_v51 = vpop.f32.mrb[13].mxu1 }
 0x4c8   : > { %v978_v52 = vpop.f32.mrb[14].mxu1 }
 0x4c9   : > { %v1447_v53 = vpop.f32.mrb[15].mxu1 }
 0x4ce   : > { %v1092_v54 = vpop.f32.mrb[16].mxu1 }
 0x4cf   : > { %1099 = vrot.lane.b32.xlu0 %v1092_v54, %s1729_s30  ;;  %v1458_v55 = vpop.f32.mrb[17].mxu1 }
 0x4d0   : > { %v1095_v56 = vpop.f32.mrb[18].mxu1 }
 0x4d1   : > { %v1459_v57 = vpop.f32.mrb[19].mxu1 }
 0x531   : > { %v866_v58 = vpop.permute.xlu0 %865 }
 0x532   : > { %869 = vst.msk [vmem:[#allocation2] sm:$0xff] %vm868_vm5, %v866_v58 }
 0x539   : > { %v983_v59 = vpop.permute.xlu1 %982 }
 0x53a   : > { %986 = vst.msk [vmem:[#allocation2] sm:$0xff] %vm985_vm6, %v983_v59 }
 0x541   : > { %v1100_v0 = vpop.permute.xlu0 %1099 }
 0x542   : > { %1103 = vst.msk [vmem:[#allocation2] sm:$0xff] %vm1102_vm7, %v1100_v0 }
 0x549   : > { %v1104_v60 = vld [vmem:[#allocation2] sm:$0xff] }
 0x54a   : > { %v1105_v61 = vpack.c.bf16 %v1104_v60, %v1104_v60 }
 0x54c   : > { %1465 = vmatmul.mubr.msk.bf16.vlgmr.msra.gmra.mrb[20].mxu0 %vm525_vm1, %v1105_v61 }
 0x61f   : > { %v1166_v63 = vpop.f32.mrb[20].mxu0 }
 0x620   : > { %v1167_v1 = vadd.f32 %v1363_v62, %v1166_v63  ;;  %v1466_v2 = vpop.f32.mrb[21].mxu0 }
 0x621   : > { %v1169_v3 = vpop.f32.mrb[22].mxu0 }
 0x622   : > { %v1467_v4 = vpop.f32.mrb[23].mxu0  ;;  %v1172_v5 = vadd.f32 %v1167_v1, %v1987_v6  ;;  %v1367_v6 = vld [vmem:[%s2119_s9] ss:$0 sm:$0xff] }
 0x624   : > { %v1173_v7 = vsel %vm525_vm1, %v1172_v5, 0.0 }
 0x625   : > { %1174 = vadd.xlane.f32.xlu1 %v1173_v7 }
 0x6b2   : > { %v1175_v8 = vpop.xlane.xlu1 %1174 }
 0x6b3   : > { %v1177_v9 = vmul.f32 0.03125, %v1175_v8 }
 0x6b5   : > { %v1178_v10 = vsub.f32 %v1172_v5, %v1177_v9 }
 0x6b7   : > { %v1179_v11 = vmul.f32 %v1178_v10, %v1178_v10 }
 0x6b9   : > { %v1180_v12 = vsel %vm525_vm1, %v1179_v11, 0.0 }
 0x6ba   : > { %1181 = vadd.xlane.f32.xlu0 %v1180_v12 }
 0x747   : > { %v1182_v13 = vpop.xlane.xlu0 %1181 }
 0x748   : > { %v1183_v14 = vmul.f32 0.03125, %v1182_v13 }
 0x74a   : > { %v1184_v15 = vadd.f32 1e-05, %v1183_v14 }
 0x74c   : > { %1567 = vrsqrt.f32 %v1184_v15 }
 0x756   : > { %v1568_v16 = vpop.eup %1567 }
 0x757   : > { %v1186_v17 = vmul.f32 %v1568_v16, %v1178_v10 }
 0x759   : > { %v1194_v20 = vmul.f32 %v1367_v6, %v1186_v17 }
 0x75b   : > { %v1202_v21 = vadd.f32 %v1368_v19, %v1194_v20 }
 0x75d   : > { %1203 = vst.msk [vmem:[%s498_s29] sm:$0xff] %vm525_vm1, %v1202_v21 }
 0x75e PF: > { %s27_s22 = sadd.s32 1, %s1713_s22   ;;  %s2151_s15 = sld [smem:[#allocation10_spill]] }
 0x75f   : > { %p24_p1 = scmp.ge.s32.totalorder %s27_s22, 4   ;;  %s2152_s19 = sld [smem:[#allocation13_spill]] }
 0x760   : > { %s2153_s20 = sld [smem:[#allocation11_spill]]  ;;  %s2154_s21 = sld [smem:[#allocation12_spill]] }
 0x761   : > { %s2155_s17 = smov %s1697_s18  ;;  %26 = sbr.rel (!%p24_p1) target bundleno = 10 (0xa), region = 128 }
 0x764   : > { %s2156_s18 = smov %s2151_s15 }
 0x768   :  { %1229 = vsyncpa [#allocation4], 1 }
 0x769   :  { %1231 = vsyncpa [#allocation4 + $0x1], 1 }
 0x76a   :  { %1232 = vsyncpa [#allocation6], 1 }
 0x76b   :  { %1234 = vsyncpa [#allocation6 + $0x1], 1 }

</bundles_post_ra>
